<compile_context>
chip_gen: v6e
topology: v6e:2x2x1
jax: 0.10.0
libtpu: 0.0.40
codegen_flags: <defaults>
</compile_context>

<pallas_src>
import jax
import jax.numpy as jnp
from jax import lax
from jax.experimental import pallas as pl
from jax.experimental.pallas import tpu as pltpu

# ---------------- config (mirrors the torch `config`) ----------------
N_EMBED      = 100   # vocab size
D_EMBED      = 32
D_HIDDEN     = 32
N_LAYERS     = 1     # single layer
BIRNN        = False # unidirectional -> seq_in_size = 4 * d_hidden
D_HIDDEN_MLP = 64
D_OUT        = 3
PAD_IDX      = 1
SEQ_LEN      = 8
BATCH        = 8     # NOTE: the biggest throughput lever is a larger batch (fills the MXU);
                     # kept small here per the spec's example shapes.

LANE        = 128                      # TPU lane width
N_VOCAB_PAD = 128                      # vocab padded to one lane-width


# ---------------------------------------------------------------------------
# Fused forward kernel.
#   tok_ref    : (T*2B, 1) int32   tokens, row index = t*2B + b (premise cols 0:B)
#   lstm_w_ref : (NV+H, 4H) bf16   rows 0:NV  = emb_pad @ W_ih^T + b_lstm (bias folded)
#                                  rows NV:   = W_hh^T
#   mlp_w_ref  : (3H+2*128+8, 128) f32  [w1p | w1h | w1ph | w2_pad | w3_pad | bias block]
#   out_ref    : (B, 128) f32      lane-dense logits (cols 3: are zero)
#   gx_ref     : (T*2B, 4H) f32    VMEM scratch: input-projected gates for all timesteps
# ---------------------------------------------------------------------------
def snli_kernel(tok_ref, lstm_w_ref, mlp_w_ref, out_ref, gx_ref):
    TB2, G = gx_ref.shape           # (T*2B, 4H) = (128, 128)
    B = out_ref.shape[0]            # 8
    B2 = 2 * B                      # 16
    T = TB2 // B2                   # 8
    H = G // 4                      # 32
    NV = lstm_w_ref.shape[0] - H    # 128 (padded vocab)
    LW = mlp_w_ref.shape[1]         # 128

    # --- embedding lookup + input projection (+ folded bias) for ALL timesteps at once.
    # one-hot(tokens) @ (E_pad @ W_ih^T + b): one bf16 (128,128)@(128,128) MXU push,
    # replacing an XLA gather + 8 tiny per-step matmuls + a bias add.
    tok = tok_ref[...]                                            # (T*2B, 1) int32
    col = lax.broadcasted_iota(jnp.int32, (TB2, NV), 1)
    onehot = (col == tok).astype(jnp.bfloat16)                    # exact 0/1 in bf16
    gx_ref[...] = jnp.dot(onehot, lstm_w_ref[0:NV, :],
                          preferred_element_type=jnp.float32)     # (T*2B, 4H) f32

    whh = lstm_w_ref[NV:NV + H, :]                                # (H, 4H) bf16, loop-invariant

    # lane mask: g-gate lanes [2H, 3H) get tanh, everything else sigmoid.
    lane = lax.broadcasted_iota(jnp.int32, (B2, G), 1)
    is_g = (lane >= 2 * H) & (lane < 3 * H)

    def step(t, carry):
        h, c = carry                                              # (2B, H) f32, in vregs
        gates = gx_ref[pl.ds(t * B2, B2), :] + jnp.dot(
            h.astype(jnp.bfloat16), whh,
            preferred_element_type=jnp.float32)                   # (2B, 4H) f32
        # Single EUP push for all gates: tanh(x) = 2*sigmoid(2x) - 1 on the g-gate lanes.
        y = jnp.where(is_g, 2.0 * gates, gates)
        s = jax.nn.sigmoid(y)
        act = jnp.where(is_g, 2.0 * s - 1.0, s)
        i_g = act[:, 0:H]
        f_g = act[:, H:2 * H]
        g_g = act[:, 2 * H:3 * H]
        o_g = act[:, 3 * H:4 * H]
        c_new = f_g * c + i_g * g_g
        h_new = o_g * jnp.tanh(c_new)
        # keep mask straight from the resident tokens: valid-then-PAD layout means
        # (tok[t, b] != PAD) <=> (t < seq_len[b]); no separate lens input/reduction.
        keep = tok_ref[pl.ds(t * B2, B2), :] != PAD_IDX           # (2B, 1) bool
        return jnp.where(keep, h_new, h), jnp.where(keep, c_new, c)

    h0 = jnp.zeros((B2, H), jnp.float32)
    c0 = jnp.zeros((B2, H), jnp.float32)
    h_fin, _ = lax.fori_loop(0, T, step, (h0, c0), unroll=True)

    # --- feature fusion + MLP (concatenate eliminated via folded W1 blocks) ---
    prem = h_fin[0:B, :]                                          # (B, H)
    hyp = h_fin[B:B2, :]                                          # (B, H)

    r = 3 * H
    w1p  = mlp_w_ref[0:H, :]                                      # (H, 128)
    w1h  = mlp_w_ref[H:2 * H, :]
    w1ph = mlp_w_ref[2 * H:3 * H, :]
    w2   = mlp_w_ref[r:r + LW, :]                                 # (128, 128) zero-padded
    w3   = mlp_w_ref[r + LW:r + 2 * LW, :]                        # (128, 128) zero-padded
    bias = mlp_w_ref[r + 2 * LW:r + 2 * LW + 8, :]                # (8, 128) aligned block
    b1 = bias[0:1, :]
    b2 = bias[1:2, :]
    b3 = bias[2:3, :]

    z1 = jnp.maximum(
        jnp.dot(prem, w1p, preferred_element_type=jnp.float32)
        + jnp.dot(hyp, w1h, preferred_element_type=jnp.float32)
        + jnp.dot(prem * hyp, w1ph, preferred_element_type=jnp.float32)
        + b1, 0.0)                                                # (B, 128); cols 64: are 0
    z2 = jnp.maximum(
        jnp.dot(z1, w2, preferred_element_type=jnp.float32) + b2, 0.0)
    # lane-dense output: w3/b3 zero-padded to 128 lanes; wrapper slices [:, :3]
    out_ref[...] = jnp.dot(z2, w3, preferred_element_type=jnp.float32) + b3


# ---------------------------------------------------------------------------
# Parameter initialization (deterministic, PyTorch-like uniform ranges)
# ---------------------------------------------------------------------------
def init_params(key):
    ks = jax.random.split(key, 12)
    u = lambda k, shape, bound: jax.random.uniform(k, shape, jnp.float32, -bound, bound)
    kh = 1.0 / jnp.sqrt(D_HIDDEN)

    params = {}
    params['embed'] = jax.random.normal(ks[0], (N_EMBED, D_EMBED), jnp.float32)
    # LSTM weights, stored transposed so the math is x @ W_ih^T, h @ W_hh^T
    params['w_ih_t'] = u(ks[1], (D_EMBED, 4 * D_HIDDEN), kh)
    params['w_hh_t'] = u(ks[2], (D_HIDDEN, 4 * D_HIDDEN), kh)
    b_ih = u(ks[3], (4 * D_HIDDEN,), kh)
    b_hh = u(ks[4], (4 * D_HIDDEN,), kh)
    params['b_lstm'] = (b_ih + b_hh)[None, :]                     # (1, 4H)

    seq_in = 4 * D_HIDDEN * (2 if BIRNN else 1)
    k1 = 1.0 / jnp.sqrt(seq_in)
    k2 = 1.0 / jnp.sqrt(D_HIDDEN_MLP)
    params['w1'] = u(ks[5], (seq_in, D_HIDDEN_MLP), k1)
    params['b1'] = u(ks[6], (1, D_HIDDEN_MLP), k1)
    params['w2'] = u(ks[7], (D_HIDDEN_MLP, D_HIDDEN_MLP), k2)
    params['b2'] = u(ks[8], (1, D_HIDDEN_MLP), k2)
    params['w3'] = u(ks[9], (D_HIDDEN_MLP, D_OUT), k2)
    params['b3'] = u(ks[10], (1, D_OUT), k2)
    return params


def fold_params(p):
    """One-time (init) weight folding/packing so the jitted forward does zero prep work.

    Produces exactly TWO weight slabs:
      slab_lstm (bf16, (NV+H, 4H)):  [emb_pad @ W_ih^T + b_lstm ; W_hh^T]
      slab_mlp  (f32,  (3H + 2*128 + 8, 128)): [w1p | w1h | w1ph | w2_pad | w3_pad | biases]
    """
    H = D_HIDDEN
    # padded embedding table folded with the input projection AND the LSTM bias
    # (each one-hot row sums to exactly 1, so the fold is exact pre-rounding).
    emb_pad = jnp.zeros((N_VOCAB_PAD, D_EMBED), jnp.float32).at[:N_EMBED].set(p['embed'])
    emb_wih = emb_pad @ p['w_ih_t'] + p['b_lstm']                 # (NV, 4H) f32
    slab_lstm = jnp.concatenate([emb_wih, p['w_hh_t']], axis=0).astype(jnp.bfloat16)

    # cat([p, h, p-h, p*h]) @ W1  ==  p@(W1a+W1c) + h@(W1b-W1c) + (p*h)@W1d
    w1 = p['w1']
    w1a, w1b, w1c, w1d = w1[0:H], w1[H:2 * H], w1[2 * H:3 * H], w1[3 * H:4 * H]
    pad_cols = lambda a: jnp.zeros((a.shape[0], LANE), jnp.float32).at[:, :a.shape[1]].set(a)
    w1p = pad_cols(w1a + w1c)                                     # (H, 128)
    w1h = pad_cols(w1b - w1c)
    w1ph = pad_cols(w1d)
    w2_pad = jnp.zeros((LANE, LANE), jnp.float32).at[:D_HIDDEN_MLP, :D_HIDDEN_MLP].set(p['w2'])
    w3_pad = jnp.zeros((LANE, LANE), jnp.float32).at[:D_HIDDEN_MLP, :D_OUT].set(p['w3'])
    bias_blk = jnp.zeros((8, LANE), jnp.float32)
    bias_blk = bias_blk.at[0, :D_HIDDEN_MLP].set(p['b1'][0])
    bias_blk = bias_blk.at[1, :D_HIDDEN_MLP].set(p['b2'][0])
    bias_blk = bias_blk.at[2, :D_OUT].set(p['b3'][0])
    slab_mlp = jnp.concatenate([w1p, w1h, w1ph, w2_pad, w3_pad, bias_blk], axis=0)

    return {'slab_lstm': slab_lstm, 'slab_mlp': slab_mlp}


# ---------------------------------------------------------------------------
# Full forward pass: a thin JAX wrapper around one pallas_call (3 inputs total).
# ---------------------------------------------------------------------------
def snli_forward(premise_tok, hypothesis_tok, fp):
    T, B = premise_tok.shape
    # stack premise | hypothesis along batch (cols 0:B = premise, B:2B = hypothesis)
    tok = jnp.concatenate([premise_tok, hypothesis_tok], axis=1)          # (T, 2B)
    tok_flat = tok.reshape(T * 2 * B, 1).astype(jnp.int32)                # (T*2B, 1)

    out = pl.pallas_call(
        snli_kernel,
        out_shape=jax.ShapeDtypeStruct((B, LANE), jnp.float32),
        in_specs=[pl.BlockSpec(memory_space=pltpu.MemorySpace.VMEM)] * 3,
        out_specs=pl.BlockSpec(memory_space=pltpu.MemorySpace.VMEM),
        scratch_shapes=[pltpu.VMEM((T * 2 * B, 4 * D_HIDDEN), jnp.float32)],
    )(tok_flat, fp['slab_lstm'], fp['slab_mlp'])
    return out[:, :D_OUT]                                                 # (B, 3)


# ---------------------------------------------------------------------------
# Pure-JAX f32 reference (unfolded params) for a correctness tolerance check.
# ---------------------------------------------------------------------------
def snli_reference(premise_tok, hypothesis_tok, p):
    def encode(tok):                                                      # (T, B)
        T, B = tok.shape
        emb = p['embed'][tok]                                             # (T, B, E)
        lens = jnp.sum((tok != PAD_IDX).astype(jnp.int32), axis=0)        # (B,)
        h = jnp.zeros((B, D_HIDDEN), jnp.float32)
        c = jnp.zeros((B, D_HIDDEN), jnp.float32)
        for t in range(T):
            gates = emb[t] @ p['w_ih_t'] + h @ p['w_hh_t'] + p['b_lstm'][0]
            i = jax.nn.sigmoid(gates[:, 0:D_HIDDEN])
            f = jax.nn.sigmoid(gates[:, D_HIDDEN:2 * D_HIDDEN])
            g = jnp.tanh(gates[:, 2 * D_HIDDEN:3 * D_HIDDEN])
            o = jax.nn.sigmoid(gates[:, 3 * D_HIDDEN:4 * D_HIDDEN])
            c_new = f * c + i * g
            h_new = o * jnp.tanh(c_new)
            keep = (lens > t)[:, None]
            h = jnp.where(keep, h_new, h)
            c = jnp.where(keep, c_new, c)
        return h
    prem = encode(premise_tok)
    hyp = encode(hypothesis_tok)
    feat = jnp.concatenate([prem, hyp, prem - hyp, prem * hyp], axis=1)
    z1 = jax.nn.relu(feat @ p['w1'] + p['b1'])
    z2 = jax.nn.relu(z1 @ p['w2'] + p['b2'])
    return z2 @ p['w3'] + p['b3']


def make_tokens(key, seq_len, batch):
    """Padded token batch (seq_len, batch): random tokens then PAD_IDX tail."""
    k_len, k_tok = jax.random.split(key)
    lengths = jax.random.randint(k_len, (batch,), 1, seq_len + 1)         # in [1, T]
    toks = jax.random.randint(k_tok, (seq_len, batch), 2, N_EMBED)
    pos = jnp.arange(seq_len)[:, None]
    return jnp.where(pos < lengths[None, :], toks, PAD_IDX).astype(jnp.int32)


if __name__ == "__main__":
    key = jax.random.PRNGKey(0)
    k_params, k_prem, k_hyp = jax.random.split(key, 3)

    params = init_params(k_params)
    fparams = fold_params(params)                      # one-time weight folding/packing
    premise = make_tokens(k_prem, SEQ_LEN, BATCH)      # (T, B) int32
    hypothesis = make_tokens(k_hyp, SEQ_LEN, BATCH)    # (T, B) int32

    scores = jax.jit(snli_forward)(premise, hypothesis, fparams)
    jax.block_until_ready(scores)
    assert scores.shape == (BATCH, D_OUT)
    assert bool(jnp.all(jnp.isfinite(scores)))

    # loose tolerance check vs. f32 reference (bf16 MXU operands, f32 accumulation)
    ref = snli_reference(premise, hypothesis, params)
    max_err = float(jnp.max(jnp.abs(scores - ref)))
    assert max_err < 5e-2, f"max |kernel - ref| = {max_err}"

    print("KERNEL_OK")
</pallas_src>

<mosaic_0001>
module attributes {stable_mosaic.version = 11 : i64} {
  func.func @snli_kernel(%arg0: memref<128x1xi32, #tpu.memory_space<vmem>>, %arg1: memref<160x128xbf16, #tpu.memory_space<vmem>>, %arg2: memref<360x128xf32, #tpu.memory_space<vmem>>, %arg3: memref<8x128xf32, #tpu.memory_space<vmem>>, %arg4: memref<128x128xf32, #tpu.memory_space<vmem>>) attributes {dimension_semantics = [], scalar_prefetch = 0 : i64, scratch_operands = 1 : i64, tpu.core_type = #tpu.core_type<tc>} {
    %c0 = arith.constant 0 : index
    %c0_0 = arith.constant 0 : index
    %0 = vector.load %arg0[%c0, %c0_0] : memref<128x1xi32, #tpu.memory_space<vmem>>, vector<128x1xi32>
    %1 = tpu.iota {dimensions = array<i32: 1>} : vector<128x128xi32>
    %2 = vector.broadcast %0 : vector<128x1xi32> to vector<128x128xi32>
    %3 = arith.cmpi eq, %1, %2 : vector<128x128xi32>
    %4 = arith.extui %3 : vector<128x128xi1> to vector<128x128xi32>
    %5 = arith.sitofp %4 : vector<128x128xi32> to vector<128x128xf32>
    %6 = arith.truncf %5 : vector<128x128xf32> to vector<128x128xbf16>
    %c0_1 = arith.constant 0 : index
    %c0_2 = arith.constant 0 : index
    %7 = vector.load %arg1[%c0_1, %c0_2] : memref<160x128xbf16, #tpu.memory_space<vmem>>, vector<128x128xbf16>
    %cst = arith.constant dense<0.000000e+00> : vector<128x128xf32>
    %8 = tpu.matmul %6, %7, %cst {dimension_numbers = #tpu.dot_dimension_numbers<[1], [0], [0], [1], [0, 0, 1, 1], [], []>} : vector<128x128xbf16>, vector<128x128xbf16>, vector<128x128xf32> -> vector<128x128xf32>
    %c0_3 = arith.constant 0 : index
    %c0_4 = arith.constant 0 : index
    %9 = vector.load %arg4[%c0_3, %c0_4] : memref<128x128xf32, #tpu.memory_space<vmem>>, vector<128x128xf32>
    tpu.vector_store %arg4[%c0_3, %c0_4], %8 {strides = array<i32>} : memref<128x128xf32, #tpu.memory_space<vmem>>, vector<128x128xf32>,
    %c128 = arith.constant 128 : index
    %c0_5 = arith.constant 0 : index
    %10 = vector.load %arg1[%c128, %c0_5] : memref<160x128xbf16, #tpu.memory_space<vmem>>, vector<32x128xbf16>
    %11 = tpu.iota {dimensions = array<i32: 1>} : vector<16x128xi32>
    %c64_i32 = arith.constant 64 : i32
    %12 = vector.broadcast %c64_i32 : i32 to vector<16x128xi32>
    %13 = arith.cmpi sge, %11, %12 : vector<16x128xi32>
    %c96_i32 = arith.constant 96 : i32
    %14 = vector.broadcast %c96_i32 : i32 to vector<16x128xi32>
    %15 = arith.cmpi slt, %11, %14 : vector<16x128xi32>
    %16 = arith.andi %13, %15 : vector<16x128xi1>
    %cst_6 = arith.constant 0.000000e+00 : f32
    %17 = vector.broadcast %cst_6 : f32 to vector<16x32xf32>
    %cst_7 = arith.constant 0.000000e+00 : f32
    %18 = vector.broadcast %cst_7 : f32 to vector<16x32xf32>
    %c0_i32 = arith.constant 0 : i32
    %c16_i32 = arith.constant 16 : i32
    %19 = arith.muli %c0_i32, %c16_i32 : i32
    %20 = arith.index_cast %19 : i32 to index
    %c0_8 = arith.constant 0 : index
    %21 = vector.load %arg4[%20, %c0_8] : memref<128x128xf32, #tpu.memory_space<vmem>>, vector<16x128xf32>
    %22 = arith.truncf %17 : vector<16x32xf32> to vector<16x32xbf16>
    %cst_9 = arith.constant dense<0.000000e+00> : vector<16x128xf32>
    %23 = tpu.matmul %22, %10, %cst_9 {dimension_numbers = #tpu.dot_dimension_numbers<[1], [0], [0], [1], [0, 0, 1, 1], [], []>} : vector<16x32xbf16>, vector<32x128xbf16>, vector<16x128xf32> -> vector<16x128xf32>
    %24 = arith.addf %21, %23 : vector<16x128xf32>
    %cst_10 = arith.constant 2.000000e+00 : f32
    %25 = vector.broadcast %cst_10 : f32 to vector<16x128xf32>
    %26 = arith.mulf %25, %24 : vector<16x128xf32>
    %27 = arith.select %16, %26, %24 : vector<16x128xi1>, vector<16x128xf32>
    %28 = arith.negf %27 : vector<16x128xf32>
    %29 = math.exp %28 : vector<16x128xf32>
    %cst_11 = arith.constant 1.000000e+00 : f32
    %30 = vector.broadcast %cst_11 : f32 to vector<16x128xf32>
    %31 = arith.addf %30, %29 : vector<16x128xf32>
    %32 = arith.divf %30, %31 : vector<16x128xf32>
    %cst_12 = arith.constant 2.000000e+00 : f32
    %33 = vector.broadcast %cst_12 : f32 to vector<16x128xf32>
    %34 = arith.mulf %33, %32 : vector<16x128xf32>
    %cst_13 = arith.constant 1.000000e+00 : f32
    %35 = vector.broadcast %cst_13 : f32 to vector<16x128xf32>
    %36 = arith.subf %34, %35 : vector<16x128xf32>
    %37 = arith.select %16, %36, %32 : vector<16x128xi1>, vector<16x128xf32>
    %38 = vector.extract_strided_slice %37 {offsets = [0, 0], sizes = [16, 32], strides = [1, 1]} : vector<16x128xf32> to vector<16x32xf32>
    %39 = vector.extract_strided_slice %37 {offsets = [0, 32], sizes = [16, 32], strides = [1, 1]} : vector<16x128xf32> to vector<16x32xf32>
    %40 = vector.extract_strided_slice %37 {offsets = [0, 64], sizes = [16, 32], strides = [1, 1]} : vector<16x128xf32> to vector<16x32xf32>
    %41 = vector.extract_strided_slice %37 {offsets = [0, 96], sizes = [16, 32], strides = [1, 1]} : vector<16x128xf32> to vector<16x32xf32>
    %42 = arith.mulf %39, %18 : vector<16x32xf32>
    %43 = arith.mulf %38, %40 : vector<16x32xf32>
    %44 = arith.addf %42, %43 : vector<16x32xf32>
    %45 = math.tanh %44 : vector<16x32xf32>
    %46 = arith.mulf %41, %45 : vector<16x32xf32>
    %c16_i32_14 = arith.constant 16 : i32
    %47 = arith.muli %c0_i32, %c16_i32_14 : i32
    %48 = arith.index_cast %47 : i32 to index
    %c0_15 = arith.constant 0 : index
    %49 = vector.load %arg0[%48, %c0_15] : memref<128x1xi32, #tpu.memory_space<vmem>>, vector<16x1xi32>
    %c1_i32 = arith.constant 1 : i32
    %50 = vector.broadcast %c1_i32 : i32 to vector<16x1xi32>
    %51 = arith.cmpi ne, %49, %50 : vector<16x1xi32>
    %52 = vector.shape_cast %51 : vector<16x1xi1> to vector<16x1xi1>
    %53 = vector.broadcast %52 : vector<16x1xi1> to vector<16x32xi1>
    %54 = arith.select %53, %46, %17 : vector<16x32xi1>, vector<16x32xf32>
    %55 = vector.shape_cast %51 : vector<16x1xi1> to vector<16x1xi1>
    %56 = vector.broadcast %55 : vector<16x1xi1> to vector<16x32xi1>
    %57 = arith.select %56, %44, %18 : vector<16x32xi1>, vector<16x32xf32>
    %c1_i32_16 = arith.constant 1 : i32
    %c16_i32_17 = arith.constant 16 : i32
    %58 = arith.muli %c1_i32_16, %c16_i32_17 : i32
    %59 = arith.index_cast %58 : i32 to index
    %c0_18 = arith.constant 0 : index
    %60 = vector.load %arg4[%59, %c0_18] : memref<128x128xf32, #tpu.memory_space<vmem>>, vector<16x128xf32>
    %61 = arith.truncf %54 : vector<16x32xf32> to vector<16x32xbf16>
    %cst_19 = arith.constant dense<0.000000e+00> : vector<16x128xf32>
    %62 = tpu.matmul %61, %10, %cst_19 {dimension_numbers = #tpu.dot_dimension_numbers<[1], [0], [0], [1], [0, 0, 1, 1], [], []>} : vector<16x32xbf16>, vector<32x128xbf16>, vector<16x128xf32> -> vector<16x128xf32>
    %63 = arith.addf %60, %62 : vector<16x128xf32>
    %cst_20 = arith.constant 2.000000e+00 : f32
    %64 = vector.broadcast %cst_20 : f32 to vector<16x128xf32>
    %65 = arith.mulf %64, %63 : vector<16x128xf32>
    %66 = arith.select %16, %65, %63 : vector<16x128xi1>, vector<16x128xf32>
    %67 = arith.negf %66 : vector<16x128xf32>
    %68 = math.exp %67 : vector<16x128xf32>
    %cst_21 = arith.constant 1.000000e+00 : f32
    %69 = vector.broadcast %cst_21 : f32 to vector<16x128xf32>
    %70 = arith.addf %69, %68 : vector<16x128xf32>
    %71 = arith.divf %69, %70 : vector<16x128xf32>
    %cst_22 = arith.constant 2.000000e+00 : f32
    %72 = vector.broadcast %cst_22 : f32 to vector<16x128xf32>
    %73 = arith.mulf %72, %71 : vector<16x128xf32>
    %cst_23 = arith.constant 1.000000e+00 : f32
    %74 = vector.broadcast %cst_23 : f32 to vector<16x128xf32>
    %75 = arith.subf %73, %74 : vector<16x128xf32>
    %76 = arith.select %16, %75, %71 : vector<16x128xi1>, vector<16x128xf32>
    %77 = vector.extract_strided_slice %76 {offsets = [0, 0], sizes = [16, 32], strides = [1, 1]} : vector<16x128xf32> to vector<16x32xf32>
    %78 = vector.extract_strided_slice %76 {offsets = [0, 32], sizes = [16, 32], strides = [1, 1]} : vector<16x128xf32> to vector<16x32xf32>
    %79 = vector.extract_strided_slice %76 {offsets = [0, 64], sizes = [16, 32], strides = [1, 1]} : vector<16x128xf32> to vector<16x32xf32>
    %80 = vector.extract_strided_slice %76 {offsets = [0, 96], sizes = [16, 32], strides = [1, 1]} : vector<16x128xf32> to vector<16x32xf32>
    %81 = arith.mulf %78, %57 : vector<16x32xf32>
    %82 = arith.mulf %77, %79 : vector<16x32xf32>
    %83 = arith.addf %81, %82 : vector<16x32xf32>
    %84 = math.tanh %83 : vector<16x32xf32>
    %85 = arith.mulf %80, %84 : vector<16x32xf32>
    %c16_i32_24 = arith.constant 16 : i32
    %86 = arith.muli %c1_i32_16, %c16_i32_24 : i32
    %87 = arith.index_cast %86 : i32 to index
    %c0_25 = arith.constant 0 : index
    %88 = vector.load %arg0[%87, %c0_25] : memref<128x1xi32, #tpu.memory_space<vmem>>, vector<16x1xi32>
    %c1_i32_26 = arith.constant 1 : i32
    %89 = vector.broadcast %c1_i32_26 : i32 to vector<16x1xi32>
    %90 = arith.cmpi ne, %88, %89 : vector<16x1xi32>
    %91 = vector.shape_cast %90 : vector<16x1xi1> to vector<16x1xi1>
    %92 = vector.broadcast %91 : vector<16x1xi1> to vector<16x32xi1>
    %93 = arith.select %92, %85, %54 : vector<16x32xi1>, vector<16x32xf32>
    %94 = vector.shape_cast %90 : vector<16x1xi1> to vector<16x1xi1>
    %95 = vector.broadcast %94 : vector<16x1xi1> to vector<16x32xi1>
    %96 = arith.select %95, %83, %57 : vector<16x32xi1>, vector<16x32xf32>
    %c2_i32 = arith.constant 2 : i32
    %c16_i32_27 = arith.constant 16 : i32
    %97 = arith.muli %c2_i32, %c16_i32_27 : i32
    %98 = arith.index_cast %97 : i32 to index
    %c0_28 = arith.constant 0 : index
    %99 = vector.load %arg4[%98, %c0_28] : memref<128x128xf32, #tpu.memory_space<vmem>>, vector<16x128xf32>
    %100 = arith.truncf %93 : vector<16x32xf32> to vector<16x32xbf16>
    %cst_29 = arith.constant dense<0.000000e+00> : vector<16x128xf32>
    %101 = tpu.matmul %100, %10, %cst_29 {dimension_numbers = #tpu.dot_dimension_numbers<[1], [0], [0], [1], [0, 0, 1, 1], [], []>} : vector<16x32xbf16>, vector<32x128xbf16>, vector<16x128xf32> -> vector<16x128xf32>
    %102 = arith.addf %99, %101 : vector<16x128xf32>
    %cst_30 = arith.constant 2.000000e+00 : f32
    %103 = vector.broadcast %cst_30 : f32 to vector<16x128xf32>
    %104 = arith.mulf %103, %102 : vector<16x128xf32>
    %105 = arith.select %16, %104, %102 : vector<16x128xi1>, vector<16x128xf32>
    %106 = arith.negf %105 : vector<16x128xf32>
    %107 = math.exp %106 : vector<16x128xf32>
    %cst_31 = arith.constant 1.000000e+00 : f32
    %108 = vector.broadcast %cst_31 : f32 to vector<16x128xf32>
    %109 = arith.addf %108, %107 : vector<16x128xf32>
    %110 = arith.divf %108, %109 : vector<16x128xf32>
    %cst_32 = arith.constant 2.000000e+00 : f32
    %111 = vector.broadcast %cst_32 : f32 to vector<16x128xf32>
    %112 = arith.mulf %111, %110 : vector<16x128xf32>
    %cst_33 = arith.constant 1.000000e+00 : f32
    %113 = vector.broadcast %cst_33 : f32 to vector<16x128xf32>
    %114 = arith.subf %112, %113 : vector<16x128xf32>
    %115 = arith.select %16, %114, %110 : vector<16x128xi1>, vector<16x128xf32>
    %116 = vector.extract_strided_slice %115 {offsets = [0, 0], sizes = [16, 32], strides = [1, 1]} : vector<16x128xf32> to vector<16x32xf32>
    %117 = vector.extract_strided_slice %115 {offsets = [0, 32], sizes = [16, 32], strides = [1, 1]} : vector<16x128xf32> to vector<16x32xf32>
    %118 = vector.extract_strided_slice %115 {offsets = [0, 64], sizes = [16, 32], strides = [1, 1]} : vector<16x128xf32> to vector<16x32xf32>
    %119 = vector.extract_strided_slice %115 {offsets = [0, 96], sizes = [16, 32], strides = [1, 1]} : vector<16x128xf32> to vector<16x32xf32>
    %120 = arith.mulf %117, %96 : vector<16x32xf32>
    %121 = arith.mulf %116, %118 : vector<16x32xf32>
    %122 = arith.addf %120, %121 : vector<16x32xf32>
    %123 = math.tanh %122 : vector<16x32xf32>
    %124 = arith.mulf %119, %123 : vector<16x32xf32>
    %c16_i32_34 = arith.constant 16 : i32
    %125 = arith.muli %c2_i32, %c16_i32_34 : i32
    %126 = arith.index_cast %125 : i32 to index
    %c0_35 = arith.constant 0 : index
    %127 = vector.load %arg0[%126, %c0_35] : memref<128x1xi32, #tpu.memory_space<vmem>>, vector<16x1xi32>
    %c1_i32_36 = arith.constant 1 : i32
    %128 = vector.broadcast %c1_i32_36 : i32 to vector<16x1xi32>
    %129 = arith.cmpi ne, %127, %128 : vector<16x1xi32>
    %130 = vector.shape_cast %129 : vector<16x1xi1> to vector<16x1xi1>
    %131 = vector.broadcast %130 : vector<16x1xi1> to vector<16x32xi1>
    %132 = arith.select %131, %124, %93 : vector<16x32xi1>, vector<16x32xf32>
    %133 = vector.shape_cast %129 : vector<16x1xi1> to vector<16x1xi1>
    %134 = vector.broadcast %133 : vector<16x1xi1> to vector<16x32xi1>
    %135 = arith.select %134, %122, %96 : vector<16x32xi1>, vector<16x32xf32>
    %c3_i32 = arith.constant 3 : i32
    %c16_i32_37 = arith.constant 16 : i32
    %136 = arith.muli %c3_i32, %c16_i32_37 : i32
    %137 = arith.index_cast %136 : i32 to index
    %c0_38 = arith.constant 0 : index
    %138 = vector.load %arg4[%137, %c0_38] : memref<128x128xf32, #tpu.memory_space<vmem>>, vector<16x128xf32>
    %139 = arith.truncf %132 : vector<16x32xf32> to vector<16x32xbf16>
    %cst_39 = arith.constant dense<0.000000e+00> : vector<16x128xf32>
    %140 = tpu.matmul %139, %10, %cst_39 {dimension_numbers = #tpu.dot_dimension_numbers<[1], [0], [0], [1], [0, 0, 1, 1], [], []>} : vector<16x32xbf16>, vector<32x128xbf16>, vector<16x128xf32> -> vector<16x128xf32>
    %141 = arith.addf %138, %140 : vector<16x128xf32>
    %cst_40 = arith.constant 2.000000e+00 : f32
    %142 = vector.broadcast %cst_40 : f32 to vector<16x128xf32>
    %143 = arith.mulf %142, %141 : vector<16x128xf32>
    %144 = arith.select %16, %143, %141 : vector<16x128xi1>, vector<16x128xf32>
    %145 = arith.negf %144 : vector<16x128xf32>
    %146 = math.exp %145 : vector<16x128xf32>
    %cst_41 = arith.constant 1.000000e+00 : f32
    %147 = vector.broadcast %cst_41 : f32 to vector<16x128xf32>
    %148 = arith.addf %147, %146 : vector<16x128xf32>
    %149 = arith.divf %147, %148 : vector<16x128xf32>
    %cst_42 = arith.constant 2.000000e+00 : f32
    %150 = vector.broadcast %cst_42 : f32 to vector<16x128xf32>
    %151 = arith.mulf %150, %149 : vector<16x128xf32>
    %cst_43 = arith.constant 1.000000e+00 : f32
    %152 = vector.broadcast %cst_43 : f32 to vector<16x128xf32>
    %153 = arith.subf %151, %152 : vector<16x128xf32>
    %154 = arith.select %16, %153, %149 : vector<16x128xi1>, vector<16x128xf32>
    %155 = vector.extract_strided_slice %154 {offsets = [0, 0], sizes = [16, 32], strides = [1, 1]} : vector<16x128xf32> to vector<16x32xf32>
    %156 = vector.extract_strided_slice %154 {offsets = [0, 32], sizes = [16, 32], strides = [1, 1]} : vector<16x128xf32> to vector<16x32xf32>
    %157 = vector.extract_strided_slice %154 {offsets = [0, 64], sizes = [16, 32], strides = [1, 1]} : vector<16x128xf32> to vector<16x32xf32>
    %158 = vector.extract_strided_slice %154 {offsets = [0, 96], sizes = [16, 32], strides = [1, 1]} : vector<16x128xf32> to vector<16x32xf32>
    %159 = arith.mulf %156, %135 : vector<16x32xf32>
    %160 = arith.mulf %155, %157 : vector<16x32xf32>
    %161 = arith.addf %159, %160 : vector<16x32xf32>
    %162 = math.tanh %161 : vector<16x32xf32>
    %163 = arith.mulf %158, %162 : vector<16x32xf32>
    %c16_i32_44 = arith.constant 16 : i32
    %164 = arith.muli %c3_i32, %c16_i32_44 : i32
    %165 = arith.index_cast %164 : i32 to index
    %c0_45 = arith.constant 0 : index
    %166 = vector.load %arg0[%165, %c0_45] : memref<128x1xi32, #tpu.memory_space<vmem>>, vector<16x1xi32>
    %c1_i32_46 = arith.constant 1 : i32
    %167 = vector.broadcast %c1_i32_46 : i32 to vector<16x1xi32>
    %168 = arith.cmpi ne, %166, %167 : vector<16x1xi32>
    %169 = vector.shape_cast %168 : vector<16x1xi1> to vector<16x1xi1>
    %170 = vector.broadcast %169 : vector<16x1xi1> to vector<16x32xi1>
    %171 = arith.select %170, %163, %132 : vector<16x32xi1>, vector<16x32xf32>
    %172 = vector.shape_cast %168 : vector<16x1xi1> to vector<16x1xi1>
    %173 = vector.broadcast %172 : vector<16x1xi1> to vector<16x32xi1>
    %174 = arith.select %173, %161, %135 : vector<16x32xi1>, vector<16x32xf32>
    %c4_i32 = arith.constant 4 : i32
    %c16_i32_47 = arith.constant 16 : i32
    %175 = arith.muli %c4_i32, %c16_i32_47 : i32
    %176 = arith.index_cast %175 : i32 to index
    %c0_48 = arith.constant 0 : index
    %177 = vector.load %arg4[%176, %c0_48] : memref<128x128xf32, #tpu.memory_space<vmem>>, vector<16x128xf32>
    %178 = arith.truncf %171 : vector<16x32xf32> to vector<16x32xbf16>
    %cst_49 = arith.constant dense<0.000000e+00> : vector<16x128xf32>
    %179 = tpu.matmul %178, %10, %cst_49 {dimension_numbers = #tpu.dot_dimension_numbers<[1], [0], [0], [1], [0, 0, 1, 1], [], []>} : vector<16x32xbf16>, vector<32x128xbf16>, vector<16x128xf32> -> vector<16x128xf32>
    %180 = arith.addf %177, %179 : vector<16x128xf32>
    %cst_50 = arith.constant 2.000000e+00 : f32
    %181 = vector.broadcast %cst_50 : f32 to vector<16x128xf32>
    %182 = arith.mulf %181, %180 : vector<16x128xf32>
    %183 = arith.select %16, %182, %180 : vector<16x128xi1>, vector<16x128xf32>
    %184 = arith.negf %183 : vector<16x128xf32>
    %185 = math.exp %184 : vector<16x128xf32>
    %cst_51 = arith.constant 1.000000e+00 : f32
    %186 = vector.broadcast %cst_51 : f32 to vector<16x128xf32>
    %187 = arith.addf %186, %185 : vector<16x128xf32>
    %188 = arith.divf %186, %187 : vector<16x128xf32>
    %cst_52 = arith.constant 2.000000e+00 : f32
    %189 = vector.broadcast %cst_52 : f32 to vector<16x128xf32>
    %190 = arith.mulf %189, %188 : vector<16x128xf32>
    %cst_53 = arith.constant 1.000000e+00 : f32
    %191 = vector.broadcast %cst_53 : f32 to vector<16x128xf32>
    %192 = arith.subf %190, %191 : vector<16x128xf32>
    %193 = arith.select %16, %192, %188 : vector<16x128xi1>, vector<16x128xf32>
    %194 = vector.extract_strided_slice %193 {offsets = [0, 0], sizes = [16, 32], strides = [1, 1]} : vector<16x128xf32> to vector<16x32xf32>
    %195 = vector.extract_strided_slice %193 {offsets = [0, 32], sizes = [16, 32], strides = [1, 1]} : vector<16x128xf32> to vector<16x32xf32>
    %196 = vector.extract_strided_slice %193 {offsets = [0, 64], sizes = [16, 32], strides = [1, 1]} : vector<16x128xf32> to vector<16x32xf32>
    %197 = vector.extract_strided_slice %193 {offsets = [0, 96], sizes = [16, 32], strides = [1, 1]} : vector<16x128xf32> to vector<16x32xf32>
    %198 = arith.mulf %195, %174 : vector<16x32xf32>
    %199 = arith.mulf %194, %196 : vector<16x32xf32>
    %200 = arith.addf %198, %199 : vector<16x32xf32>
    %201 = math.tanh %200 : vector<16x32xf32>
    %202 = arith.mulf %197, %201 : vector<16x32xf32>
    %c16_i32_54 = arith.constant 16 : i32
    %203 = arith.muli %c4_i32, %c16_i32_54 : i32
    %204 = arith.index_cast %203 : i32 to index
    %c0_55 = arith.constant 0 : index
    %205 = vector.load %arg0[%204, %c0_55] : memref<128x1xi32, #tpu.memory_space<vmem>>, vector<16x1xi32>
    %c1_i32_56 = arith.constant 1 : i32
    %206 = vector.broadcast %c1_i32_56 : i32 to vector<16x1xi32>
    %207 = arith.cmpi ne, %205, %206 : vector<16x1xi32>
    %208 = vector.shape_cast %207 : vector<16x1xi1> to vector<16x1xi1>
    %209 = vector.broadcast %208 : vector<16x1xi1> to vector<16x32xi1>
    %210 = arith.select %209, %202, %171 : vector<16x32xi1>, vector<16x32xf32>
    %211 = vector.shape_cast %207 : vector<16x1xi1> to vector<16x1xi1>
    %212 = vector.broadcast %211 : vector<16x1xi1> to vector<16x32xi1>
    %213 = arith.select %212, %200, %174 : vector<16x32xi1>, vector<16x32xf32>
    %c5_i32 = arith.constant 5 : i32
    %c16_i32_57 = arith.constant 16 : i32
    %214 = arith.muli %c5_i32, %c16_i32_57 : i32
    %215 = arith.index_cast %214 : i32 to index
    %c0_58 = arith.constant 0 : index
    %216 = vector.load %arg4[%215, %c0_58] : memref<128x128xf32, #tpu.memory_space<vmem>>, vector<16x128xf32>
    %217 = arith.truncf %210 : vector<16x32xf32> to vector<16x32xbf16>
    %cst_59 = arith.constant dense<0.000000e+00> : vector<16x128xf32>
    %218 = tpu.matmul %217, %10, %cst_59 {dimension_numbers = #tpu.dot_dimension_numbers<[1], [0], [0], [1], [0, 0, 1, 1], [], []>} : vector<16x32xbf16>, vector<32x128xbf16>, vector<16x128xf32> -> vector<16x128xf32>
    %219 = arith.addf %216, %218 : vector<16x128xf32>
    %cst_60 = arith.constant 2.000000e+00 : f32
    %220 = vector.broadcast %cst_60 : f32 to vector<16x128xf32>
    %221 = arith.mulf %220, %219 : vector<16x128xf32>
    %222 = arith.select %16, %221, %219 : vector<16x128xi1>, vector<16x128xf32>
    %223 = arith.negf %222 : vector<16x128xf32>
    %224 = math.exp %223 : vector<16x128xf32>
    %cst_61 = arith.constant 1.000000e+00 : f32
    %225 = vector.broadcast %cst_61 : f32 to vector<16x128xf32>
    %226 = arith.addf %225, %224 : vector<16x128xf32>
    %227 = arith.divf %225, %226 : vector<16x128xf32>
    %cst_62 = arith.constant 2.000000e+00 : f32
    %228 = vector.broadcast %cst_62 : f32 to vector<16x128xf32>
    %229 = arith.mulf %228, %227 : vector<16x128xf32>
    %cst_63 = arith.constant 1.000000e+00 : f32
    %230 = vector.broadcast %cst_63 : f32 to vector<16x128xf32>
    %231 = arith.subf %229, %230 : vector<16x128xf32>
    %232 = arith.select %16, %231, %227 : vector<16x128xi1>, vector<16x128xf32>
    %233 = vector.extract_strided_slice %232 {offsets = [0, 0], sizes = [16, 32], strides = [1, 1]} : vector<16x128xf32> to vector<16x32xf32>
    %234 = vector.extract_strided_slice %232 {offsets = [0, 32], sizes = [16, 32], strides = [1, 1]} : vector<16x128xf32> to vector<16x32xf32>
    %235 = vector.extract_strided_slice %232 {offsets = [0, 64], sizes = [16, 32], strides = [1, 1]} : vector<16x128xf32> to vector<16x32xf32>
    %236 = vector.extract_strided_slice %232 {offsets = [0, 96], sizes = [16, 32], strides = [1, 1]} : vector<16x128xf32> to vector<16x32xf32>
    %237 = arith.mulf %234, %213 : vector<16x32xf32>
    %238 = arith.mulf %233, %235 : vector<16x32xf32>
    %239 = arith.addf %237, %238 : vector<16x32xf32>
    %240 = math.tanh %239 : vector<16x32xf32>
    %241 = arith.mulf %236, %240 : vector<16x32xf32>
    %c16_i32_64 = arith.constant 16 : i32
    %242 = arith.muli %c5_i32, %c16_i32_64 : i32
    %243 = arith.index_cast %242 : i32 to index
    %c0_65 = arith.constant 0 : index
    %244 = vector.load %arg0[%243, %c0_65] : memref<128x1xi32, #tpu.memory_space<vmem>>, vector<16x1xi32>
    %c1_i32_66 = arith.constant 1 : i32
    %245 = vector.broadcast %c1_i32_66 : i32 to vector<16x1xi32>
    %246 = arith.cmpi ne, %244, %245 : vector<16x1xi32>
    %247 = vector.shape_cast %246 : vector<16x1xi1> to vector<16x1xi1>
    %248 = vector.broadcast %247 : vector<16x1xi1> to vector<16x32xi1>
    %249 = arith.select %248, %241, %210 : vector<16x32xi1>, vector<16x32xf32>
    %250 = vector.shape_cast %246 : vector<16x1xi1> to vector<16x1xi1>
    %251 = vector.broadcast %250 : vector<16x1xi1> to vector<16x32xi1>
    %252 = arith.select %251, %239, %213 : vector<16x32xi1>, vector<16x32xf32>
    %c6_i32 = arith.constant 6 : i32
    %c16_i32_67 = arith.constant 16 : i32
    %253 = arith.muli %c6_i32, %c16_i32_67 : i32
    %254 = arith.index_cast %253 : i32 to index
    %c0_68 = arith.constant 0 : index
    %255 = vector.load %arg4[%254, %c0_68] : memref<128x128xf32, #tpu.memory_space<vmem>>, vector<16x128xf32>
    %256 = arith.truncf %249 : vector<16x32xf32> to vector<16x32xbf16>
    %cst_69 = arith.constant dense<0.000000e+00> : vector<16x128xf32>
    %257 = tpu.matmul %256, %10, %cst_69 {dimension_numbers = #tpu.dot_dimension_numbers<[1], [0], [0], [1], [0, 0, 1, 1], [], []>} : vector<16x32xbf16>, vector<32x128xbf16>, vector<16x128xf32> -> vector<16x128xf32>
    %258 = arith.addf %255, %257 : vector<16x128xf32>
    %cst_70 = arith.constant 2.000000e+00 : f32
    %259 = vector.broadcast %cst_70 : f32 to vector<16x128xf32>
    %260 = arith.mulf %259, %258 : vector<16x128xf32>
    %261 = arith.select %16, %260, %258 : vector<16x128xi1>, vector<16x128xf32>
    %262 = arith.negf %261 : vector<16x128xf32>
    %263 = math.exp %262 : vector<16x128xf32>
    %cst_71 = arith.constant 1.000000e+00 : f32
    %264 = vector.broadcast %cst_71 : f32 to vector<16x128xf32>
    %265 = arith.addf %264, %263 : vector<16x128xf32>
    %266 = arith.divf %264, %265 : vector<16x128xf32>
    %cst_72 = arith.constant 2.000000e+00 : f32
    %267 = vector.broadcast %cst_72 : f32 to vector<16x128xf32>
    %268 = arith.mulf %267, %266 : vector<16x128xf32>
    %cst_73 = arith.constant 1.000000e+00 : f32
    %269 = vector.broadcast %cst_73 : f32 to vector<16x128xf32>
    %270 = arith.subf %268, %269 : vector<16x128xf32>
    %271 = arith.select %16, %270, %266 : vector<16x128xi1>, vector<16x128xf32>
    %272 = vector.extract_strided_slice %271 {offsets = [0, 0], sizes = [16, 32], strides = [1, 1]} : vector<16x128xf32> to vector<16x32xf32>
    %273 = vector.extract_strided_slice %271 {offsets = [0, 32], sizes = [16, 32], strides = [1, 1]} : vector<16x128xf32> to vector<16x32xf32>
    %274 = vector.extract_strided_slice %271 {offsets = [0, 64], sizes = [16, 32], strides = [1, 1]} : vector<16x128xf32> to vector<16x32xf32>
    %275 = vector.extract_strided_slice %271 {offsets = [0, 96], sizes = [16, 32], strides = [1, 1]} : vector<16x128xf32> to vector<16x32xf32>
    %276 = arith.mulf %273, %252 : vector<16x32xf32>
    %277 = arith.mulf %272, %274 : vector<16x32xf32>
    %278 = arith.addf %276, %277 : vector<16x32xf32>
    %279 = math.tanh %278 : vector<16x32xf32>
    %280 = arith.mulf %275, %279 : vector<16x32xf32>
    %c16_i32_74 = arith.constant 16 : i32
    %281 = arith.muli %c6_i32, %c16_i32_74 : i32
    %282 = arith.index_cast %281 : i32 to index
    %c0_75 = arith.constant 0 : index
    %283 = vector.load %arg0[%282, %c0_75] : memref<128x1xi32, #tpu.memory_space<vmem>>, vector<16x1xi32>
    %c1_i32_76 = arith.constant 1 : i32
    %284 = vector.broadcast %c1_i32_76 : i32 to vector<16x1xi32>
    %285 = arith.cmpi ne, %283, %284 : vector<16x1xi32>
    %286 = vector.shape_cast %285 : vector<16x1xi1> to vector<16x1xi1>
    %287 = vector.broadcast %286 : vector<16x1xi1> to vector<16x32xi1>
    %288 = arith.select %287, %280, %249 : vector<16x32xi1>, vector<16x32xf32>
    %289 = vector.shape_cast %285 : vector<16x1xi1> to vector<16x1xi1>
    %290 = vector.broadcast %289 : vector<16x1xi1> to vector<16x32xi1>
    %291 = arith.select %290, %278, %252 : vector<16x32xi1>, vector<16x32xf32>
    %c7_i32 = arith.constant 7 : i32
    %c16_i32_77 = arith.constant 16 : i32
    %292 = arith.muli %c7_i32, %c16_i32_77 : i32
    %293 = arith.index_cast %292 : i32 to index
    %c0_78 = arith.constant 0 : index
    %294 = vector.load %arg4[%293, %c0_78] : memref<128x128xf32, #tpu.memory_space<vmem>>, vector<16x128xf32>
    %295 = arith.truncf %288 : vector<16x32xf32> to vector<16x32xbf16>
    %cst_79 = arith.constant dense<0.000000e+00> : vector<16x128xf32>
    %296 = tpu.matmul %295, %10, %cst_79 {dimension_numbers = #tpu.dot_dimension_numbers<[1], [0], [0], [1], [0, 0, 1, 1], [], []>} : vector<16x32xbf16>, vector<32x128xbf16>, vector<16x128xf32> -> vector<16x128xf32>
    %297 = arith.addf %294, %296 : vector<16x128xf32>
    %cst_80 = arith.constant 2.000000e+00 : f32
    %298 = vector.broadcast %cst_80 : f32 to vector<16x128xf32>
    %299 = arith.mulf %298, %297 : vector<16x128xf32>
    %300 = arith.select %16, %299, %297 : vector<16x128xi1>, vector<16x128xf32>
    %301 = arith.negf %300 : vector<16x128xf32>
    %302 = math.exp %301 : vector<16x128xf32>
    %cst_81 = arith.constant 1.000000e+00 : f32
    %303 = vector.broadcast %cst_81 : f32 to vector<16x128xf32>
    %304 = arith.addf %303, %302 : vector<16x128xf32>
    %305 = arith.divf %303, %304 : vector<16x128xf32>
    %cst_82 = arith.constant 2.000000e+00 : f32
    %306 = vector.broadcast %cst_82 : f32 to vector<16x128xf32>
    %307 = arith.mulf %306, %305 : vector<16x128xf32>
    %cst_83 = arith.constant 1.000000e+00 : f32
    %308 = vector.broadcast %cst_83 : f32 to vector<16x128xf32>
    %309 = arith.subf %307, %308 : vector<16x128xf32>
    %310 = arith.select %16, %309, %305 : vector<16x128xi1>, vector<16x128xf32>
    %311 = vector.extract_strided_slice %310 {offsets = [0, 0], sizes = [16, 32], strides = [1, 1]} : vector<16x128xf32> to vector<16x32xf32>
    %312 = vector.extract_strided_slice %310 {offsets = [0, 32], sizes = [16, 32], strides = [1, 1]} : vector<16x128xf32> to vector<16x32xf32>
    %313 = vector.extract_strided_slice %310 {offsets = [0, 64], sizes = [16, 32], strides = [1, 1]} : vector<16x128xf32> to vector<16x32xf32>
    %314 = vector.extract_strided_slice %310 {offsets = [0, 96], sizes = [16, 32], strides = [1, 1]} : vector<16x128xf32> to vector<16x32xf32>
    %315 = arith.mulf %312, %291 : vector<16x32xf32>
    %316 = arith.mulf %311, %313 : vector<16x32xf32>
    %317 = arith.addf %315, %316 : vector<16x32xf32>
    %318 = math.tanh %317 : vector<16x32xf32>
    %319 = arith.mulf %314, %318 : vector<16x32xf32>
    %c16_i32_84 = arith.constant 16 : i32
    %320 = arith.muli %c7_i32, %c16_i32_84 : i32
    %321 = arith.index_cast %320 : i32 to index
    %c0_85 = arith.constant 0 : index
    %322 = vector.load %arg0[%321, %c0_85] : memref<128x1xi32, #tpu.memory_space<vmem>>, vector<16x1xi32>
    %c1_i32_86 = arith.constant 1 : i32
    %323 = vector.broadcast %c1_i32_86 : i32 to vector<16x1xi32>
    %324 = arith.cmpi ne, %322, %323 : vector<16x1xi32>
    %325 = vector.shape_cast %324 : vector<16x1xi1> to vector<16x1xi1>
    %326 = vector.broadcast %325 : vector<16x1xi1> to vector<16x32xi1>
    %327 = arith.select %326, %319, %288 : vector<16x32xi1>, vector<16x32xf32>
    %328 = vector.shape_cast %324 : vector<16x1xi1> to vector<16x1xi1>
    %329 = vector.broadcast %328 : vector<16x1xi1> to vector<16x32xi1>
    %330 = arith.select %329, %317, %291 : vector<16x32xi1>, vector<16x32xf32>
    %c8_i32 = arith.constant 8 : i32
    %331 = vector.extract_strided_slice %327 {offsets = [0, 0], sizes = [8, 32], strides = [1, 1]} : vector<16x32xf32> to vector<8x32xf32>
    %332 = vector.extract_strided_slice %327 {offsets = [8, 0], sizes = [8, 32], strides = [1, 1]} : vector<16x32xf32> to vector<8x32xf32>
    %c0_87 = arith.constant 0 : index
    %c0_88 = arith.constant 0 : index
    %333 = vector.load %arg2[%c0_87, %c0_88] : memref<360x128xf32, #tpu.memory_space<vmem>>, vector<32x128xf32>
    %c32 = arith.constant 32 : index
    %c0_89 = arith.constant 0 : index
    %334 = vector.load %arg2[%c32, %c0_89] : memref<360x128xf32, #tpu.memory_space<vmem>>, vector<32x128xf32>
    %c64 = arith.constant 64 : index
    %c0_90 = arith.constant 0 : index
    %335 = vector.load %arg2[%c64, %c0_90] : memref<360x128xf32, #tpu.memory_space<vmem>>, vector<32x128xf32>
    %c96 = arith.constant 96 : index
    %c0_91 = arith.constant 0 : index
    %336 = vector.load %arg2[%c96, %c0_91] : memref<360x128xf32, #tpu.memory_space<vmem>>, vector<128x128xf32>
    %c224 = arith.constant 224 : index
    %c0_92 = arith.constant 0 : index
    %337 = vector.load %arg2[%c224, %c0_92] : memref<360x128xf32, #tpu.memory_space<vmem>>, vector<128x128xf32>
    %c352 = arith.constant 352 : index
    %c0_93 = arith.constant 0 : index
    %338 = vector.load %arg2[%c352, %c0_93] : memref<360x128xf32, #tpu.memory_space<vmem>>, vector<8x128xf32>
    %339 = vector.extract_strided_slice %338 {offsets = [0, 0], sizes = [1, 128], strides = [1, 1]} : vector<8x128xf32> to vector<1x128xf32>
    %340 = vector.extract_strided_slice %338 {offsets = [1, 0], sizes = [1, 128], strides = [1, 1]} : vector<8x128xf32> to vector<1x128xf32>
    %341 = vector.extract_strided_slice %338 {offsets = [2, 0], sizes = [1, 128], strides = [1, 1]} : vector<8x128xf32> to vector<1x128xf32>
    %cst_94 = arith.constant dense<0.000000e+00> : vector<8x128xf32>
    %342 = tpu.matmul %331, %333, %cst_94 {dimension_numbers = #tpu.dot_dimension_numbers<[1], [0], [0], [1], [0, 0, 1, 1], [], []>} : vector<8x32xf32>, vector<32x128xf32>, vector<8x128xf32> -> vector<8x128xf32>
    %cst_95 = arith.constant dense<0.000000e+00> : vector<8x128xf32>
    %343 = tpu.matmul %332, %334, %cst_95 {dimension_numbers = #tpu.dot_dimension_numbers<[1], [0], [0], [1], [0, 0, 1, 1], [], []>} : vector<8x32xf32>, vector<32x128xf32>, vector<8x128xf32> -> vector<8x128xf32>
    %344 = arith.addf %342, %343 : vector<8x128xf32>
    %345 = arith.mulf %331, %332 : vector<8x32xf32>
    %cst_96 = arith.constant dense<0.000000e+00> : vector<8x128xf32>
    %346 = tpu.matmul %345, %335, %cst_96 {dimension_numbers = #tpu.dot_dimension_numbers<[1], [0], [0], [1], [0, 0, 1, 1], [], []>} : vector<8x32xf32>, vector<32x128xf32>, vector<8x128xf32> -> vector<8x128xf32>
    %347 = arith.addf %344, %346 : vector<8x128xf32>
    %348 = vector.broadcast %339 : vector<1x128xf32> to vector<8x128xf32>
    %349 = arith.addf %347, %348 : vector<8x128xf32>
    %cst_97 = arith.constant 0.000000e+00 : f32
    %350 = vector.broadcast %cst_97 : f32 to vector<8x128xf32>
    %351 = arith.maximumf %349, %350 : vector<8x128xf32>
    %cst_98 = arith.constant dense<0.000000e+00> : vector<8x128xf32>
    %352 = tpu.matmul %351, %336, %cst_98 {dimension_numbers = #tpu.dot_dimension_numbers<[1], [0], [0], [1], [0, 0, 1, 1], [], []>} : vector<8x128xf32>, vector<128x128xf32>, vector<8x128xf32> -> vector<8x128xf32>
    %353 = vector.broadcast %340 : vector<1x128xf32> to vector<8x128xf32>
    %354 = arith.addf %352, %353 : vector<8x128xf32>
    %cst_99 = arith.constant 0.000000e+00 : f32
    %355 = vector.broadcast %cst_99 : f32 to vector<8x128xf32>
    %356 = arith.maximumf %354, %355 : vector<8x128xf32>
    %cst_100 = arith.constant dense<0.000000e+00> : vector<8x128xf32>
    %357 = tpu.matmul %356, %337, %cst_100 {dimension_numbers = #tpu.dot_dimension_numbers<[1], [0], [0], [1], [0, 0, 1, 1], [], []>} : vector<8x128xf32>, vector<128x128xf32>, vector<8x128xf32> -> vector<8x128xf32>
    %358 = vector.broadcast %341 : vector<1x128xf32> to vector<8x128xf32>
    %359 = arith.addf %357, %358 : vector<8x128xf32>
    %c0_101 = arith.constant 0 : index
    %c0_102 = arith.constant 0 : index
    %360 = vector.load %arg3[%c0_101, %c0_102] : memref<8x128xf32, #tpu.memory_space<vmem>>, vector<8x128xf32>
    tpu.vector_store %arg3[%c0_101, %c0_102], %359 {strides = array<i32>} : memref<8x128xf32, #tpu.memory_space<vmem>>, vector<8x128xf32>,
    return
  }
}

</mosaic_0001>

<bundles_post_ra>
// kernel: snli_forward.1
= control target key start
LH: loop header
LB: loop body
LE: loop exit
PB: predicated region body
PF: predicated region fallthrough
CT: control target
= control target key end

     0   :  { %8 = vsyncpa [#allocation4], 0  ;;  %s2294_s12 = smov [#allocation3]   ;;  %s3040_s0 = inlined_call_operand.vmem [shape: s32[128,1], index: 0, kind: input, shape index: {}]   ;;  %s3041_s1 = inlined_call_operand.vmem [shape: bf16[160,128], index: 1, kind: input, shape index: {}]   ;;  %s3042_s2 = inlined_call_operand.hbm [shape: f32[360,128], index: 2, kind: input, shape index: {}]   ;;  %s3043_s3 = inlined_call_operand.vmem [shape: f32[8,128], index: 3, kind: output, shape index: {}]  }
   0x1   :  { %s18_s13 = sshll.u32 %s2294_s12, 4  ;;  %s19_s13 = int_to_ptr.vmem [resolvable:$true] %s18_s13 }
   0x2   :  { %s2280_s14 = scalar_lea.vmem %s19_s13, 5760  ;;  %p2285_p1 = scmp.lt.s32.totalorder %s19_s13, %s19_s13 }
   0x3   :  { %p2281_p0 = scmp.ne.s32.totalorder %s19_s13, %s2280_s14  ;;  %p2286_p2 = scmp.lt.s32.totalorder %s2280_s14, %s2280_s14 }
   0x5   :  { %p2287_p3 = por %p2286_p2, %p2285_p1 }
   0x7   :  { %p2288_p4 = pnand %p2287_p3, %p2281_p0 }
   0x9   :  { %2291 = shalt.err (!%p2288_p4)
}
   0xa   :  { %s2295_s15 = smov 128   ;;  %s2296_s16 = smov 8  }
   0xb   :  { %24 = dma.hbm_to_vmem [thread:$0]  %s3042_s2, 5760, %s19_s13, [#allocation4], %s2295_s15, %s2295_s15, %s2296_s16  }
   0xc   :  { %2292 = dma.done.wait [#allocation4], 5760  }
   0xd   :  { %2293 = vsyncadd [#allocation4], 4294961536  ;;  %v2297_v0 = vmov 0   ;;  %v2298_v1 = vmov 0.0   ;;  %vm2299_vm0 = vmmov 0   ;;  %v2334_v2 = vld [vmem:[%s3040_s0 + $0x10] sm:$0xff]  ;;  %v45_v16 = vlaneseq }
   0xe   :  { %2165 = vset.pattern.permute.xlu1 %v2297_v0  ;;  %2164 = vset.pattern.permute.xlu0 %v2297_v0  ;;  %v2339_v3 = vld [vmem:[%s3040_s0] sm:$0xff]  ;;  %v2344_v4 = vld [vmem:[%s3040_s0 + $0x18] sm:$0xff]  ;;  %v2351_v5 = vld [vmem:[%s3040_s0 + $0x8] sm:$0xff]  ;;  %v2300_v22 = vmov 1.0|1.0   ;;  %s2302_s19 = smov 32  }
   0xf   :  { %1988 = vmatprep.subr.bf16.mxu1 %v2298_v1  ;;  %1992 = vmatprep.mubr.msk.bf16.mxu1 %vm2299_vm0, %v2298_v1  ;;  %v2166_v6 = vld [vmem:[%s3041_s1 + $0x38] sm:$0xff]   ;;  %v2167_v7 = vld [vmem:[%s3041_s1 + $0x30] sm:$0xff]   ;;  %v2168_v8 = vld [vmem:[%s3041_s1 + $0x28] sm:$0xff]   ;;  %v2402_v19 = vand.u32 127, %v45_v16  ;;  %vm454_vm10 = vcmp.ne.s32.totalorder %v2339_v3, 1  ;;  %vm455_vm11 = vcmp.ne.s32.totalorder %v2351_v5, 1 }
  0x10   :  { %54 = vperm.xlu1 %2165, %v2334_v2   ;;  %48 = vperm.xlu0 %2164, %v2339_v3   ;;  %v2367_v9 = vld [vmem:[%s3041_s1 + $0x48] sm:$0xff]   ;;  %v2373_v10 = vld [vmem:[%s3041_s1 + $0x40] sm:$0xff]   ;;  %v2170_v12 = vld [vmem:[%s3041_s1 + $0x18] sm:$0xff]   ;;  %v456_v55 = vsel %vm454_vm10, 1, %v2297_v0  ;;  %v457_v57 = vsel %vm455_vm11, 1, %v2297_v0  ;;  %vm349_vm14 = vcmask 261120  }
  0x11   :  { %1956 = vmatprep.subr.bf16.mxu0 %v2166_v6  ;;  %1989 = vmatpush3.bf16.msra.mxu1 %v2367_v9  ;;  %v2169_v11 = vld [vmem:[%s3041_s1 + $0x20] sm:$0xff]   ;;  %v2171_v13 = vld [vmem:[%s3041_s1 + $0x10] sm:$0xff]   ;;  %v2173_v14 = vld [vmem:[%s3041_s1 + $0x8] sm:$0xff]   ;;  %vm332_vm7 = vcmp.ge.s32.totalorder %v2402_v19, 64  ;;  %vm333_vm8 = vcmp.lt.s32.totalorder %v2402_v19, 96  ;;  %vm580_vm15 = vcmp.ne.s32.totalorder %v2334_v2, 1 }
  0x12   :  { %1957 = vmatpush3.bf16.msra.mxu0 %v2166_v6  ;;  %1990 = vmatprep.subr.bf16.mxu1 %v2298_v1  ;;  %v2175_v15 = vld [vmem:[%s3041_s1] sm:$0xff]   ;;  %vm2418_vm9 = vmand %vm332_vm7, %vm333_vm8  ;;  %s2301_s1 = smov 64  }
  0x13   :  { %1958 = vmatprep.subr.bf16.mxu0 %v2167_v7 }
  0x14   :  { %57 = vperm.xlu1 %2165, %v2344_v4   ;;  %51 = vperm.xlu0 %2164, %v2351_v5  }
  0x15   :  { %1991 = vmatpush3.bf16.msra.mxu1 %v2373_v10 }
  0x16   :  { %1959 = vmatpush3.bf16.msra.mxu0 %v2167_v7  ;;  %1996 = vmatprep.subr.bf16.mxu1 %v2298_v1 }
  0x17   :  { %1960 = vmatprep.subr.bf16.mxu0 %v2168_v8 }
  0x18   :  { %1993 = vmatmul.mubr.bf16.vlgmr.msra.gmra.mxu1 %v2297_v0 }
  0x19   :  { %1997 = vmatpush3.bf16.msra.mxu1 %v2367_v9  ;;  %2000 = vmatprep.mubr.msk.bf16.mxu1 %vm2299_vm0, %v2298_v1 }
  0x1a   :  { %1961 = vmatpush3.bf16.msra.mxu0 %v2168_v8  ;;  %1998 = vmatprep.subr.bf16.mxu1 %v2298_v1 }
  0x1b   :  { %1962 = vmatprep.subr.bf16.mxu0 %v2169_v11 }
  0x1d   :  { %1999 = vmatpush3.bf16.msra.mxu1 %v2373_v10 }
  0x1e   :  { %1963 = vmatpush3.bf16.msra.mxu0 %v2169_v11  ;;  %2004 = vmatprep.subr.bf16.mxu1 %v2298_v1 }
  0x1f   :  { %1964 = vmatprep.subr.bf16.mxu0 %v2170_v12 }
  0x22   :  { %1965 = vmatpush3.bf16.msra.mxu0 %v2170_v12 }
  0x23   :  { %1966 = vmatprep.subr.bf16.mxu0 %v2171_v13 }
  0x26   :  { %1967 = vmatpush3.bf16.msra.mxu0 %v2171_v13 }
  0x27   :  { %1968 = vmatprep.subr.bf16.mxu0 %v2173_v14 }
  0x2a   :  { %1969 = vmatpush3.bf16.msra.mxu0 %v2173_v14 }
  0x2b   :  { %1970 = vmatprep.subr.bf16.mxu0 %v2175_v15 }
  0x2e   :  { %1971 = vmatpush3.bf16.msra.mxu0 %v2175_v15 }
  0x2f   :  { %2044 = vmatprep.subr.bf16.mxu0 %v2298_v1 }
  0x8b   :  { %v55_v17 = vpop.permute.xlu1 %54  ;;  %v49_v18 = vpop.permute.xlu0 %48 }
  0x8c   :  { %vm97_vm1 = vcmp.eq.s32.totalorder %v2402_v19, %v55_v17  ;;  %vm95_vm4 = vcmp.eq.s32.totalorder %v2402_v19, %v49_v18 }
  0x8f   :  { %v58_v20 = vpop.permute.xlu1 %57  ;;  %v52_v21 = vpop.permute.xlu0 %51 }
  0x90   :  { %vm98_vm2 = vcmp.eq.s32.totalorder %v2402_v19, %v58_v20  ;;  %vm96_vm3 = vcmp.eq.s32.totalorder %v2402_v19, %v52_v21 }
  0x91   :  { %vm1809_vm5 = vmpackc.low %vm98_vm2, %vm97_vm1  ;;  %vm581_vm1 = vcmp.ne.s32.totalorder %v2344_v4, 1 }
  0x92   :  { %vm1807_vm6 = vmpackc.low %vm96_vm3, %vm95_vm4 }
  0x93   :  { %1972 = vmatprep.mubr.msk.bf16.mxu0 %vm1807_vm6, %v2300_v22 }
  0x94   :  { %1973 = vmatmul.mubr.msk.bf16.vlgmr.msra.gmra.mxu0 %vm1809_vm5, %v2300_v22 }
  0x95   :  { %2045 = vmatpush3.bf16.msra.mxu0 %v2367_v9 }
  0x96   :  { %2046 = vmatprep.subr.bf16.mxu0 %v2298_v1 }
  0x99   :  { %2047 = vmatpush3.bf16.msra.mxu0 %v2373_v10 }
  0x9a   :  { %2063 = vmatprep.subr.mxu0 %v2298_v1 }
  0xd8   :  { %v387_v23 = vpop.f32.mrf.mxu1 }
  0xda   :  { %v1994_v24 = vpop.f32.mrf.mxu1 }
  0xdc   :  { %v390_v25 = vpop.f32.mrf.mxu1 }
  0xde   :  { %v1995_v26 = vpop.f32.mrf.mxu1 }
 0x154   :  { %v2414_v27 = vpop.f32.mrf.mxu0 }
 0x156   :  { %v249_v28 = vpop.f32.mrf.mxu0 }
 0x157   :  { %v394_v29 = vadd.f32 %v387_v23, %v249_v28 }
 0x158   :  { %v2422_v31 = vpop.f32.mrf.mxu0 }
 0x159   :  { %v396_v32 = vmul.f32 2.0, %v394_v29 }
 0x15a   :  { %v252_v33 = vpop.f32.mrf.mxu0 }
 0x15b   :  { %v398_v34 = vsel %vm2418_vm9, %v396_v32, %v394_v29  ;;  %v395_v35 = vadd.f32 %v390_v25, %v252_v33 }
 0x15c   :  { %v1825_v36 = vmul.f32 -1.442695, %v398_v34 }
 0x15d   :  { %v397_v37 = vmul.f32 2.0, %v395_v35 }
 0x15e   :  { %2176 = vpow2.f32 %v1825_v36 }
 0x15f   :  { %v399_v38 = vsel %vm2418_vm9, %v397_v37, %v395_v35 }
 0x160   :  { %v1826_v39 = vmul.f32 -1.442695, %v399_v38 }
 0x162   :  { %2178 = vpow2.f32 %v1826_v39 }
 0x16b   :  { %v2177_v40 = vpop.eup %2176 }
 0x16c   :  { %v406_v41 = vadd.f32 1.0, %v2177_v40 }
 0x16e   :  { %2180 = vrcp.f32 %v406_v41 }
 0x16f   :  { %v2179_v42 = vpop.eup %2178 }
 0x170   :  { %v407_v43 = vadd.f32 1.0, %v2179_v42 }
 0x172   :  { %2182 = vrcp.f32 %v407_v43 }
 0x17b   :  { %v2181_v44 = vpop.eup %2180 }
 0x17c   :  { %v412_v45 = vmul.f32 2.0, %v2181_v44 }
 0x17e   :  { %v1827_v46 = vadd.f32 -1.0, %v412_v45 }
 0x17f   :  { %v2183_v47 = vpop.eup %2182 }
 0x180   :  { %v416_v48 = vsel %vm2418_vm9, %v1827_v46, %v2181_v44  ;;  %v413_v49 = vmul.f32 2.0, %v2183_v47 }
 0x181   :  { %422 = vrot.lane.b32.xlu0 %v416_v48, %s2301_s1  ;;  %v418_v58 = vmul.f32 0.0, %v416_v48 }
 0x182   :  { %v1828_v50 = vadd.f32 -1.0, %v413_v49  ;;  %v582_v49 = vsel %vm580_vm15, 1, %v2297_v0 }
 0x184   :  { %v417_v51 = vsel %vm2418_vm9, %v1828_v50, %v2183_v47 }
 0x185   :  { %424 = vrot.lane.b32.xlu1 %v417_v51, %s2301_s1  ;;  %v419_v61 = vmul.f32 0.0, %v417_v51 }
 0x1f3   :  { %v423_v52 = vpop.permute.xlu0 %422 }
 0x1f4   :  { %v428_v53 = vmul.f32 %v423_v52, %v416_v48 }
 0x1f6   :  { %432 = vrot.lane.b32.xlu0 %v428_v53, %s2302_s19 }
 0x1f7   :  { %v425_v54 = vpop.permute.xlu1 %424 }
 0x1f8   :  { %v429_v56 = vmul.f32 %v425_v54, %v417_v51 }
 0x1fa   :  { %459 = vperm.xlu0 %2164, %v456_v55   ;;  %434 = vrot.lane.b32.xlu1 %v429_v56, %s2302_s19 }
 0x1fe   :  { %462 = vperm.xlu1 %2165, %v457_v57  }
 0x268   :  { %v433_v59 = vpop.permute.xlu0 %432 }
 0x269   :  { %v2440_v60 = vadd.f32 %v433_v59, %v418_v58  ;;  %v2512_v59 = vld [vmem:[%s3040_s0 + $0x20] sm:$0xff] }
 0x26a   :  { %vm706_vm11 = vcmp.ne.s32.totalorder %v2512_v59, 1 }
 0x26b   :  { %2184 = vtanh.f32 %v2440_v60 }
 0x26c   :  { %v435_v62 = vpop.permute.xlu1 %434 }
 0x26d   :  { %v2443_v63 = vadd.f32 %v435_v62, %v419_v61  ;;  %v2519_v61 = vld [vmem:[%s3040_s0 + $0x30] sm:$0xff]  ;;  %v2524_v62 = vld [vmem:[%s3040_s0 + $0x28] sm:$0xff] }
 0x26f   :  { %2186 = vtanh.f32 %v2443_v63 }
 0x275   :  { %v2448_v6 = vpop.permute.xlu0 %459 }
 0x276   :  { %vm464_vm12 = vcmp.eq.s32.totalorder %v2448_v6, 1 }
 0x277   :  { %v2493_v52 = vsel %vm464_vm12, %v2440_v60, 0.0 }
 0x278   :  { %v2185_v3 = vpop.eup %2184 }
 0x279   :  { %444 = vrot.lane.b32.xlu0 %v2185_v3, %s2301_s1  ;;  %v2450_v7 = vpop.permute.xlu1 %462 }
 0x27a   :  { %vm465_vm13 = vcmp.eq.s32.totalorder %v2450_v7, 1 }
 0x27b   :  { %v2501_v4 = vsel %vm465_vm13, %v2443_v63, 0.0  ;;  %v2531_v63 = vld [vmem:[%s3040_s0 + $0x38] sm:$0xff] }
 0x27c   :  { %v2187_v5 = vpop.eup %2186 }
 0x27d   :  { %446 = vrot.lane.b32.xlu1 %v2187_v5, %s2301_s1 }
 0x2eb   :  { %v445_v8 = vpop.permute.xlu0 %444 }
 0x2ec   :  { %v450_v11 = vmul.f32 %v445_v8, %v416_v48 }
 0x2ee   :  { %v2456_v14 = vsel %vm464_vm12, %v450_v11, 0.0  ;;  %vm707_vm12 = vcmp.ne.s32.totalorder %v2524_v62, 1 }
 0x2ef   :  { %v447_v12 = vpop.permute.xlu1 %446 }
 0x2f0   :  { %v451_v13 = vmul.f32 %v447_v12, %v417_v51  ;;  %v583_v51 = vsel %vm581_vm1, 1, %v2297_v0  ;;  %vm832_vm1 = vcmp.ne.s32.totalorder %v2519_v61, 1 }
 0x2f2   :  { %v2460_v15 = vsel %vm465_vm13, %v451_v13, 0.0 }
 0x2f3   :  { %v472_v17 = vpack.c.bf16 %v2460_v15, %v2456_v14 }
 0x2f5   :  { %474 = vrot.lane.b32.xlu0 %v472_v17, %s2302_s19 }
 0x367   :  { %v475_v18 = vpop.permute.xlu0 %474 }
 0x368   :  { %2001 = vmatmul.mubr.msk.bf16.vlgmr.msra.gmra.mxu1 %vm349_vm14, %v475_v18 }
 0x369   :  { %2005 = vmatpush3.bf16.msra.mxu1 %v2367_v9  ;;  %2008 = vmatprep.mubr.msk.bf16.mxu1 %vm2299_vm0, %v2298_v1 }
 0x36a   :  { %2006 = vmatprep.subr.bf16.mxu1 %v2298_v1 }
 0x36d   :  { %2007 = vmatpush3.bf16.msra.mxu1 %v2373_v10 }
 0x36e   :  { %2012 = vmatprep.subr.bf16.mxu1 %v2298_v1 }
 0x428   :  { %v513_v20 = vpop.f32.mrf.mxu1 }
 0x429   :  { %v520_v21 = vadd.f32 %v2414_v27, %v513_v20 }
 0x42a   :  { %v2002_v23 = vpop.f32.mrf.mxu1 }
 0x42b   :  { %v522_v24 = vmul.f32 2.0, %v520_v21 }
 0x42c   :  { %v516_v25 = vpop.f32.mrf.mxu1 }
 0x42d   :  { %v524_v26 = vsel %vm2418_vm9, %v522_v24, %v520_v21  ;;  %v521_v28 = vadd.f32 %v2422_v31, %v516_v25 }
 0x42e   :  { %v1830_v29 = vmul.f32 -1.442695, %v524_v26  ;;  %v2003_v32 = vpop.f32.mrf.mxu1 }
 0x42f   :  { %v523_v33 = vmul.f32 2.0, %v521_v28 }
 0x430   :  { %2188 = vpow2.f32 %v1830_v29 }
 0x431   :  { %v525_v34 = vsel %vm2418_vm9, %v523_v33, %v521_v28 }
 0x432   :  { %v1831_v35 = vmul.f32 -1.442695, %v525_v34 }
 0x434   :  { %2190 = vpow2.f32 %v1831_v35 }
 0x43d   :  { %v2189_v36 = vpop.eup %2188 }
 0x43e   :  { %v532_v37 = vadd.f32 1.0, %v2189_v36 }
 0x440   :  { %2192 = vrcp.f32 %v532_v37 }
 0x441   :  { %v2191_v27 = vpop.eup %2190 }
 0x442   :  { %v533_v38 = vadd.f32 1.0, %v2191_v27 }
 0x444   :  { %2194 = vrcp.f32 %v533_v38 }
 0x44d   :  { %v2193_v39 = vpop.eup %2192 }
 0x44e   :  { %v538_v40 = vmul.f32 2.0, %v2193_v39 }
 0x450   :  { %v1832_v41 = vadd.f32 -1.0, %v538_v40 }
 0x451   :  { %v2195_v42 = vpop.eup %2194 }
 0x452   :  { %v542_v31 = vsel %vm2418_vm9, %v1832_v41, %v2193_v39  ;;  %v539_v43 = vmul.f32 2.0, %v2195_v42 }
 0x453   :  { %548 = vrot.lane.b32.xlu1 %v542_v31, %s2301_s1  ;;  %v544_v2 = vmul.f32 %v542_v31, %v2493_v52 }
 0x454   :  { %v1833_v44 = vadd.f32 -1.0, %v539_v43 }
 0x456   :  { %v543_v45 = vsel %vm2418_vm9, %v1833_v44, %v2195_v42 }
 0x457   :  { %550 = vrot.lane.b32.xlu0 %v543_v45, %s2301_s1  ;;  %v545_v55 = vmul.f32 %v543_v45, %v2501_v4 }
 0x4c5   :  { %v549_v46 = vpop.permute.xlu1 %548 }
 0x4c6   :  { %v554_v47 = vmul.f32 %v549_v46, %v542_v31 }
 0x4c8   :  { %558 = vrot.lane.b32.xlu1 %v554_v47, %s2302_s19 }
 0x4c9   :  { %v551_v48 = vpop.permute.xlu0 %550 }
 0x4ca   :  { %v555_v50 = vmul.f32 %v551_v48, %v543_v45 }
 0x4cc   :  { %585 = vperm.xlu1 %2165, %v582_v49   ;;  %560 = vrot.lane.b32.xlu0 %v555_v50, %s2302_s19 }
 0x4d0   :  { %588 = vperm.xlu0 %2164, %v583_v51  }
 0x53a   :  { %v559_v53 = vpop.permute.xlu1 %558 }
 0x53b   :  { %v2496_v54 = vadd.f32 %v559_v53, %v544_v2 }
 0x53d   :  { %2196 = vtanh.f32 %v2496_v54 }
 0x53e   :  { %v561_v56 = vpop.permute.xlu0 %560 }
 0x53f   :  { %v2505_v57 = vadd.f32 %v561_v56, %v545_v55  ;;  %v708_v56 = vsel %vm706_vm11, 1, %v2297_v0 }
 0x541   :  { %2198 = vtanh.f32 %v2505_v57 }
 0x547   :  { %v2534_v3 = vpop.permute.xlu1 %585 }
 0x548   :  { %vm590_vm2 = vcmp.eq.s32.totalorder %v2534_v3, 1 }
 0x54a   :  { %v2197_v58 = vpop.eup %2196 }
 0x54b   :  { %570 = vrot.lane.b32.xlu1 %v2197_v58, %s2301_s1  ;;  %v2536_v5 = vpop.permute.xlu0 %588 }
 0x54c   :  { %vm591_vm3 = vcmp.eq.s32.totalorder %v2536_v5, 1 }
 0x54e   :  { %v2199_v60 = vpop.eup %2198 }
 0x54f   :  { %60 = vperm.xlu1 %2165, %v2512_v59   ;;  %572 = vrot.lane.b32.xlu0 %v2199_v60, %s2301_s1  ;;  %v709_v60 = vsel %vm707_vm12, 1, %v2297_v0 }
 0x553   :  { %66 = vperm.xlu1 %2165, %v2519_v61   ;;  %63 = vperm.xlu0 %2164, %v2524_v62   ;;  %v2599_v62 = vsel %vm591_vm3, %v2505_v57, %v2501_v4 }
 0x557   :  { %69 = vperm.xlu0 %2164, %v2531_v63  }
 0x5bd   :  { %v571_v6 = vpop.permute.xlu1 %570 }
 0x5be   :  { %v576_v7 = vmul.f32 %v571_v6, %v542_v31  ;;  %v2590_v6 = vsel %vm590_vm2, %v2496_v54, %v2493_v52 }
 0x5c0   :  { %v2543_v12 = vsel %vm590_vm2, %v576_v7, %v2456_v14  ;;  %vm833_vm2 = vcmp.ne.s32.totalorder %v2531_v63, 1 }
 0x5c1   :  { %v573_v8 = vpop.permute.xlu0 %572 }
 0x5c2   :  { %v577_v11 = vmul.f32 %v573_v8, %v543_v45 }
 0x5c4   :  { %v2548_v13 = vsel %vm591_vm3, %v577_v11, %v2460_v15 }
 0x5c5   :  { %v598_v17 = vpack.c.bf16 %v2548_v13, %v2543_v12 }
 0x5c7   :  { %600 = vrot.lane.b32.xlu1 %v598_v17, %s2302_s19 }
 0x5ca   :  { %v61_v18 = vpop.permute.xlu1 %60 }
 0x5cb   :  { %vm99_vm4 = vcmp.eq.s32.totalorder %v2402_v19, %v61_v18 }
 0x5ce   :  { %v64_v20 = vpop.permute.xlu0 %63  ;;  %v67_v21 = vpop.permute.xlu1 %66 }
 0x5cf   :  { %vm100_vm5 = vcmp.eq.s32.totalorder %v2402_v19, %v64_v20  ;;  %vm101_vm7 = vcmp.eq.s32.totalorder %v2402_v19, %v67_v21 }
 0x5d0   :  { %vm1811_vm6 = vmpackc.low %vm100_vm5, %vm99_vm4 }
 0x5d1   :  { %1976 = vmatprep.mubr.msk.bf16.mxu0 %vm1811_vm6, %v2300_v22 }
 0x5d2   :  { %v70_v14 = vpop.permute.xlu0 %69 }
 0x5d3   :  { %vm102_vm8 = vcmp.eq.s32.totalorder %v2402_v19, %v70_v14 }
 0x5d4   :  { %vm1813_vm10 = vmpackc.low %vm102_vm8, %vm101_vm7 }
 0x5d5   :  { %1977 = vmatmul.mubr.msk.bf16.gmra.mxu0 %vm1813_vm10, %v2300_v22 }
 0x639   :  { %v601_v15 = vpop.permute.xlu1 %600 }
 0x63a   :  { %2009 = vmatmul.mubr.msk.bf16.vlgmr.msra.gmra.mxu1 %vm349_vm14, %v601_v15 }
 0x63b   :  { %2013 = vmatpush3.bf16.msra.mxu1 %v2367_v9  ;;  %2016 = vmatprep.mubr.msk.bf16.mxu1 %vm2299_vm0, %v2298_v1 }
 0x63c   :  { %2014 = vmatprep.subr.bf16.mxu1 %v2298_v1 }
 0x63f   :  { %2015 = vmatpush3.bf16.msra.mxu1 %v2373_v10 }
 0x640   :  { %2020 = vmatprep.subr.bf16.mxu1 %v2298_v1 }
 0x695   :  { %v2566_v23 = vpop.f32.mrf.mxu0 }
 0x697   :  { %v265_v24 = vpop.f32.mrf.mxu0 }
 0x699   :  { %v2568_v25 = vpop.f32.mrf.mxu0 }
 0x69b   :  { %v268_v33 = vpop.f32.mrf.mxu0 }
 0x6fa   :  { %v639_v26 = vpop.f32.mrf.mxu1 }
 0x6fb   :  { %v646_v28 = vadd.f32 %v639_v26, %v265_v24 }
 0x6fc   :  { %v2010_v29 = vpop.f32.mrf.mxu1 }
 0x6fd   :  { %v648_v32 = vmul.f32 2.0, %v646_v28 }
 0x6fe   :  { %v642_v34 = vpop.f32.mrf.mxu1 }
 0x6ff   :  { %v650_v35 = vsel %vm2418_vm9, %v648_v32, %v646_v28  ;;  %v647_v36 = vadd.f32 %v642_v34, %v268_v33 }
 0x700   :  { %v1835_v37 = vmul.f32 -1.442695, %v650_v35  ;;  %v2011_v27 = vpop.f32.mrf.mxu1 }
 0x701   :  { %v649_v38 = vmul.f32 2.0, %v647_v36 }
 0x702   :  { %2200 = vpow2.f32 %v1835_v37 }
 0x703   :  { %v651_v39 = vsel %vm2418_vm9, %v649_v38, %v647_v36 }
 0x704   :  { %v1836_v40 = vmul.f32 -1.442695, %v651_v39 }
 0x706   :  { %2202 = vpow2.f32 %v1836_v40 }
 0x70f   :  { %v2201_v41 = vpop.eup %2200 }
 0x710   :  { %v658_v42 = vadd.f32 1.0, %v2201_v41 }
 0x712   :  { %2204 = vrcp.f32 %v658_v42 }
 0x713   :  { %v2203_v31 = vpop.eup %2202 }
 0x714   :  { %v659_v43 = vadd.f32 1.0, %v2203_v31 }
 0x716   :  { %2206 = vrcp.f32 %v659_v43 }
 0x71f   :  { %v2205_v44 = vpop.eup %2204 }
 0x720   :  { %v664_v45 = vmul.f32 2.0, %v2205_v44 }
 0x722   :  { %v1837_v46 = vadd.f32 -1.0, %v664_v45 }
 0x723   :  { %v2207_v47 = vpop.eup %2206 }
 0x724   :  { %v668_v48 = vsel %vm2418_vm9, %v1837_v46, %v2205_v44  ;;  %v665_v49 = vmul.f32 2.0, %v2207_v47 }
 0x725   :  { %674 = vrot.lane.b32.xlu0 %v668_v48, %s2301_s1  ;;  %v670_v59 = vmul.f32 %v668_v48, %v2590_v6 }
 0x726   :  { %v1838_v50 = vadd.f32 -1.0, %v665_v49 }
 0x728   :  { %v669_v51 = vsel %vm2418_vm9, %v1838_v50, %v2207_v47 }
 0x729   :  { %676 = vrot.lane.b32.xlu1 %v669_v51, %s2301_s1  ;;  %v671_v11 = vmul.f32 %v669_v51, %v2599_v62 }
 0x797   :  { %v675_v2 = vpop.permute.xlu0 %674 }
 0x798   :  { %v680_v53 = vmul.f32 %v675_v2, %v668_v48 }
 0x79a   :  { %684 = vrot.lane.b32.xlu0 %v680_v53, %s2302_s19  ;;  %v835_v53 = vsel %vm833_vm2, 1, %v2297_v0 }
 0x79b   :  { %v677_v55 = vpop.permute.xlu1 %676 }
 0x79c   :  { %v681_v58 = vmul.f32 %v677_v55, %v669_v51 }
 0x79e   :  { %711 = vperm.xlu0 %2164, %v708_v56   ;;  %686 = vrot.lane.b32.xlu1 %v681_v58, %s2302_s19 }
 0x7a2   :  { %714 = vperm.xlu1 %2165, %v709_v60  }
 0x80c   :  { %v685_v7 = vpop.permute.xlu0 %684 }
 0x80d   :  { %v2593_v8 = vadd.f32 %v685_v7, %v670_v59 }
 0x80f   :  { %2208 = vtanh.f32 %v2593_v8 }
 0x810   :  { %v687_v17 = vpop.permute.xlu1 %686 }
 0x811   :  { %v2603_v18 = vadd.f32 %v687_v17, %v671_v11  ;;  %v2688_v17 = vld [vmem:[%s3040_s0 + $0x48] sm:$0xff] }
 0x813   :  { %2210 = vtanh.f32 %v2603_v18 }
 0x819   :  { %v2608_v3 = vpop.permute.xlu0 %711 }
 0x81a   :  { %vm716_vm13 = vcmp.eq.s32.totalorder %v2608_v3, 1 }
 0x81b   :  { %v2656_v55 = vsel %vm716_vm13, %v2593_v8, %v2590_v6  ;;  %v2676_v8 = vld [vmem:[%s3040_s0 + $0x40] sm:$0xff] }
 0x81c   :  { %v2209_v52 = vpop.eup %2208  ;;  %vm958_vm12 = vcmp.ne.s32.totalorder %v2676_v8, 1 }
 0x81d   :  { %696 = vrot.lane.b32.xlu0 %v2209_v52, %s2301_s1  ;;  %v2610_v5 = vpop.permute.xlu1 %714 }
 0x81e   :  { %vm717_vm15 = vcmp.eq.s32.totalorder %v2610_v5, 1 }
 0x81f   :  { %v2665_v63 = vsel %vm717_vm15, %v2603_v18, %v2599_v62  ;;  %v2683_v62 = vld [vmem:[%s3040_s0 + $0x50] sm:$0xff]  ;;  %v2695_v18 = vld [vmem:[%s3040_s0 + $0x58] sm:$0xff] }
 0x820   :  { %v2211_v54 = vpop.eup %2210  ;;  %vm1084_vm2 = vcmp.ne.s32.totalorder %v2683_v62, 1 }
 0x821   :  { %698 = vrot.lane.b32.xlu1 %v2211_v54, %s2301_s1 }
 0x88f   :  { %v697_v4 = vpop.permute.xlu0 %696 }
 0x890   :  { %v702_v57 = vmul.f32 %v697_v4, %v668_v48 }
 0x892   :  { %v2617_v14 = vsel %vm716_vm13, %v702_v57, %v2543_v12  ;;  %vm959_vm13 = vcmp.ne.s32.totalorder %v2688_v17, 1 }
 0x893   :  { %v699_v20 = vpop.permute.xlu1 %698 }
 0x894   :  { %v703_v21 = vmul.f32 %v699_v20, %v669_v51  ;;  %v834_v51 = vsel %vm832_vm1, 1, %v2297_v0 }
 0x896   :  { %v2622_v15 = vsel %vm717_vm15, %v703_v21, %v2548_v13 }
 0x897   :  { %v724_v24 = vpack.c.bf16 %v2622_v15, %v2617_v14 }
 0x899   :  { %726 = vrot.lane.b32.xlu0 %v724_v24, %s2302_s19 }
 0x90b   :  { %v727_v26 = vpop.permute.xlu0 %726 }
 0x90c   :  { %2017 = vmatmul.mubr.msk.bf16.vlgmr.msra.gmra.mxu1 %vm349_vm14, %v727_v26 }
 0x90d   :  { %2021 = vmatpush3.bf16.msra.mxu1 %v2367_v9  ;;  %2024 = vmatprep.mubr.msk.bf16.mxu1 %vm2299_vm0, %v2298_v1 }
 0x90e   :  { %2022 = vmatprep.subr.bf16.mxu1 %v2298_v1 }
 0x911   :  { %2023 = vmatpush3.bf16.msra.mxu1 %v2373_v10 }
 0x912   :  { %2028 = vmatprep.subr.bf16.mxu1 %v2298_v1 }
 0x9cc   :  { %v765_v12 = vpop.f32.mrf.mxu1 }
 0x9cd   :  { %v772_v13 = vadd.f32 %v2566_v23, %v765_v12 }
 0x9ce   :  { %v2018_v28 = vpop.f32.mrf.mxu1 }
 0x9cf   :  { %v774_v29 = vmul.f32 2.0, %v772_v13 }
 0x9d0   :  { %v768_v32 = vpop.f32.mrf.mxu1 }
 0x9d1   :  { %v776_v33 = vsel %vm2418_vm9, %v774_v29, %v772_v13  ;;  %v773_v34 = vadd.f32 %v2568_v25, %v768_v32 }
 0x9d2   :  { %v1840_v35 = vmul.f32 -1.442695, %v776_v33  ;;  %v2019_v36 = vpop.f32.mrf.mxu1 }
 0x9d3   :  { %v775_v37 = vmul.f32 2.0, %v773_v34 }
 0x9d4   :  { %2212 = vpow2.f32 %v1840_v35 }
 0x9d5   :  { %v777_v27 = vsel %vm2418_vm9, %v775_v37, %v773_v34 }
 0x9d6   :  { %v1841_v38 = vmul.f32 -1.442695, %v777_v27 }
 0x9d8   :  { %2214 = vpow2.f32 %v1841_v38 }
 0x9e1   :  { %v2213_v39 = vpop.eup %2212 }
 0x9e2   :  { %v784_v40 = vadd.f32 1.0, %v2213_v39 }
 0x9e4   :  { %2216 = vrcp.f32 %v784_v40 }
 0x9e5   :  { %v2215_v23 = vpop.eup %2214 }
 0x9e6   :  { %v785_v41 = vadd.f32 1.0, %v2215_v23 }
 0x9e8   :  { %2218 = vrcp.f32 %v785_v41 }
 0x9f1   :  { %v2217_v42 = vpop.eup %2216 }
 0x9f2   :  { %v790_v31 = vmul.f32 2.0, %v2217_v42 }
 0x9f4   :  { %v1842_v43 = vadd.f32 -1.0, %v790_v31 }
 0x9f5   :  { %v2219_v44 = vpop.eup %2218 }
 0x9f6   :  { %v794_v25 = vsel %vm2418_vm9, %v1842_v43, %v2217_v42  ;;  %v791_v45 = vmul.f32 2.0, %v2219_v44 }
 0x9f7   :  { %800 = vrot.lane.b32.xlu1 %v794_v25, %s2301_s1  ;;  %v796_v61 = vmul.f32 %v794_v25, %v2656_v55 }
 0x9f8   :  { %v1843_v46 = vadd.f32 -1.0, %v791_v45 }
 0x9fa   :  { %v795_v47 = vsel %vm2418_vm9, %v1843_v46, %v2219_v44 }
 0x9fb   :  { %802 = vrot.lane.b32.xlu0 %v795_v47, %s2301_s1  ;;  %v797_v60 = vmul.f32 %v795_v47, %v2665_v63 }
 0xa69   :  { %v801_v48 = vpop.permute.xlu1 %800 }
 0xa6a   :  { %v806_v49 = vmul.f32 %v801_v48, %v794_v25 }
 0xa6c   :  { %810 = vrot.lane.b32.xlu1 %v806_v49, %s2302_s19 }
 0xa6d   :  { %v803_v50 = vpop.permute.xlu0 %802 }
 0xa6e   :  { %v807_v2 = vmul.f32 %v803_v50, %v795_v47 }
 0xa70   :  { %837 = vperm.xlu1 %2165, %v834_v51   ;;  %812 = vrot.lane.b32.xlu0 %v807_v2, %s2302_s19 }
 0xa74   :  { %840 = vperm.xlu0 %2164, %v835_v53  }
 0xade   :  { %v811_v56 = vpop.permute.xlu1 %810 }
 0xadf   :  { %v2659_v58 = vadd.f32 %v811_v56, %v796_v61 }
 0xae1   :  { %2220 = vtanh.f32 %v2659_v58 }
 0xae2   :  { %v813_v59 = vpop.permute.xlu0 %812 }
 0xae3   :  { %v2669_v7 = vadd.f32 %v813_v59, %v797_v60  ;;  %v960_v59 = vsel %vm958_vm12, 1, %v2297_v0 }
 0xae5   :  { %2222 = vtanh.f32 %v2669_v7 }
 0xaeb   :  { %v2698_v52 = vpop.permute.xlu1 %837 }
 0xaec   :  { %vm842_vm3 = vcmp.eq.s32.totalorder %v2698_v52, 1 }
 0xaee   :  { %v2221_v6 = vpop.eup %2220 }
 0xaef   :  { %822 = vrot.lane.b32.xlu1 %v2221_v6, %s2301_s1  ;;  %v2700_v54 = vpop.permute.xlu0 %840 }
 0xaf0   :  { %vm843_vm4 = vcmp.eq.s32.totalorder %v2700_v54, 1 }
 0xaf2   :  { %v2223_v11 = vpop.eup %2222 }
 0xaf3   :  { %72 = vperm.xlu1 %2165, %v2676_v8   ;;  %824 = vrot.lane.b32.xlu0 %v2223_v11, %s2301_s1  ;;  %v961_v11 = vsel %vm959_vm13, 1, %v2297_v0 }
 0xaf7   :  { %78 = vperm.xlu1 %2165, %v2683_v62   ;;  %75 = vperm.xlu0 %2164, %v2688_v17   ;;  %v2763_v17 = vsel %vm843_vm4, %v2669_v7, %v2665_v63 }
 0xafb   :  { %81 = vperm.xlu0 %2164, %v2695_v18  }
 0xb61   :  { %v823_v3 = vpop.permute.xlu1 %822 }
 0xb62   :  { %v828_v5 = vmul.f32 %v823_v3, %v794_v25  ;;  %v2754_v3 = vsel %vm842_vm3, %v2659_v58, %v2656_v55 }
 0xb64   :  { %v2707_v20 = vsel %vm842_vm3, %v828_v5, %v2617_v14  ;;  %vm1085_vm3 = vcmp.ne.s32.totalorder %v2695_v18, 1 }
 0xb65   :  { %v825_v4 = vpop.permute.xlu0 %824 }
 0xb66   :  { %v829_v57 = vmul.f32 %v825_v4, %v795_v47 }
 0xb68   :  { %v2712_v21 = vsel %vm843_vm4, %v829_v57, %v2622_v15 }
 0xb69   :  { %v850_v24 = vpack.c.bf16 %v2712_v21, %v2707_v20 }
 0xb6b   :  { %852 = vrot.lane.b32.xlu1 %v850_v24, %s2302_s19 }
 0xb6e   :  { %v73_v26 = vpop.permute.xlu1 %72 }
 0xb6f   :  { %vm103_vm5 = vcmp.eq.s32.totalorder %v2402_v19, %v73_v26 }
 0xb72   :  { %v76_v12 = vpop.permute.xlu0 %75  ;;  %v79_v13 = vpop.permute.xlu1 %78 }
 0xb73   :  { %vm104_vm6 = vcmp.eq.s32.totalorder %v2402_v19, %v76_v12  ;;  %vm105_vm8 = vcmp.eq.s32.totalorder %v2402_v19, %v79_v13 }
 0xb74   :  { %vm1815_vm7 = vmpackc.low %vm104_vm6, %vm103_vm5 }
 0xb75   :  { %1980 = vmatprep.mubr.msk.bf16.mxu0 %vm1815_vm7, %v2300_v22 }
 0xb76   :  { %v82_v14 = vpop.permute.xlu0 %81 }
 0xb77   :  { %vm106_vm10 = vcmp.eq.s32.totalorder %v2402_v19, %v82_v14 }
 0xb78   :  { %vm1817_vm11 = vmpackc.low %vm106_vm10, %vm105_vm8 }
 0xb79   :  { %1981 = vmatmul.mubr.msk.bf16.gmra.mxu0 %vm1817_vm11, %v2300_v22 }
 0xbdd   :  { %v853_v15 = vpop.permute.xlu1 %852 }
 0xbde   :  { %2025 = vmatmul.mubr.msk.bf16.vlgmr.msra.gmra.mxu1 %vm349_vm14, %v853_v15 }
 0xbdf   :  { %2029 = vmatpush3.bf16.msra.mxu1 %v2367_v9  ;;  %2032 = vmatprep.mubr.msk.bf16.mxu1 %vm2299_vm0, %v2298_v1 }
 0xbe0   :  { %2030 = vmatprep.subr.bf16.mxu1 %v2298_v1 }
 0xbe3   :  { %2031 = vmatpush3.bf16.msra.mxu1 %v2373_v10 }
 0xbe4   :  { %2036 = vmatprep.subr.bf16.mxu1 %v2298_v1 }
 0xc39   :  { %v2730_v28 = vpop.f32.mrf.mxu0 }
 0xc3b   :  { %v281_v29 = vpop.f32.mrf.mxu0 }
 0xc3d   :  { %v2732_v32 = vpop.f32.mrf.mxu0 }
 0xc3f   :  { %v284_v37 = vpop.f32.mrf.mxu0 }
 0xc9e   :  { %v891_v33 = vpop.f32.mrf.mxu1 }
 0xc9f   :  { %v898_v34 = vadd.f32 %v891_v33, %v281_v29 }
 0xca0   :  { %v2026_v35 = vpop.f32.mrf.mxu1 }
 0xca1   :  { %v900_v36 = vmul.f32 2.0, %v898_v34 }
 0xca2   :  { %v894_v27 = vpop.f32.mrf.mxu1 }
 0xca3   :  { %v902_v38 = vsel %vm2418_vm9, %v900_v36, %v898_v34  ;;  %v899_v39 = vadd.f32 %v894_v27, %v284_v37 }
 0xca4   :  { %v1845_v40 = vmul.f32 -1.442695, %v902_v38  ;;  %v2027_v23 = vpop.f32.mrf.mxu1 }
 0xca5   :  { %v901_v41 = vmul.f32 2.0, %v899_v39 }
 0xca6   :  { %2224 = vpow2.f32 %v1845_v40 }
 0xca7   :  { %v903_v42 = vsel %vm2418_vm9, %v901_v41, %v899_v39 }
 0xca8   :  { %v1846_v31 = vmul.f32 -1.442695, %v903_v42 }
 0xcaa   :  { %2226 = vpow2.f32 %v1846_v31 }
 0xcb3   :  { %v2225_v43 = vpop.eup %2224 }
 0xcb4   :  { %v910_v44 = vadd.f32 1.0, %v2225_v43 }
 0xcb6   :  { %2228 = vrcp.f32 %v910_v44 }
 0xcb7   :  { %v2227_v25 = vpop.eup %2226 }
 0xcb8   :  { %v911_v45 = vadd.f32 1.0, %v2227_v25 }
 0xcba   :  { %2230 = vrcp.f32 %v911_v45 }
 0xcc3   :  { %v2229_v46 = vpop.eup %2228 }
 0xcc4   :  { %v916_v47 = vmul.f32 2.0, %v2229_v46 }
 0xcc6   :  { %v1847_v48 = vadd.f32 -1.0, %v916_v47 }
 0xcc7   :  { %v2231_v49 = vpop.eup %2230 }
 0xcc8   :  { %v920_v50 = vsel %vm2418_vm9, %v1847_v48, %v2229_v46  ;;  %v917_v51 = vmul.f32 2.0, %v2231_v49 }
 0xcc9   :  { %926 = vrot.lane.b32.xlu0 %v920_v50, %s2301_s1  ;;  %v922_v8 = vmul.f32 %v920_v50, %v2754_v3 }
 0xcca   :  { %v1848_v2 = vadd.f32 -1.0, %v917_v51  ;;  %v1086_v51 = vsel %vm1084_vm2, 1, %v2297_v0 }
 0xccc   :  { %v921_v53 = vsel %vm2418_vm9, %v1848_v2, %v2231_v49 }
 0xccd   :  { %928 = vrot.lane.b32.xlu1 %v921_v53, %s2301_s1  ;;  %v923_v57 = vmul.f32 %v921_v53, %v2763_v17 }
 0xd3b   :  { %v927_v61 = vpop.permute.xlu0 %926 }
 0xd3c   :  { %v932_v56 = vmul.f32 %v927_v61, %v920_v50 }
 0xd3e   :  { %936 = vrot.lane.b32.xlu0 %v932_v56, %s2302_s19 }
 0xd3f   :  { %v929_v60 = vpop.permute.xlu1 %928 }
 0xd40   :  { %v933_v6 = vmul.f32 %v929_v60, %v921_v53 }
 0xd42   :  { %963 = vperm.xlu0 %2164, %v960_v59   ;;  %938 = vrot.lane.b32.xlu1 %v933_v6, %s2302_s19 }
 0xd46   :  { %966 = vperm.xlu1 %2165, %v961_v11  }
 0xdb0   :  { %v937_v5 = vpop.permute.xlu0 %936 }
 0xdb1   :  { %v2757_v4 = vadd.f32 %v937_v5, %v922_v8  ;;  %v2840_v8 = vld [vmem:[%s3040_s0 + $0x60] sm:$0xff] }
 0xdb2   :  { %vm1210_vm13 = vcmp.ne.s32.totalorder %v2840_v8, 1 }
 0xdb3   :  { %2232 = vtanh.f32 %v2757_v4 }
 0xdb4   :  { %v939_v24 = vpop.permute.xlu1 %938 }
 0xdb5   :  { %v2767_v26 = vadd.f32 %v939_v24, %v923_v57  ;;  %v2859_v57 = vld [vmem:[%s3040_s0 + $0x78] sm:$0xff] }
 0xdb7   :  { %2234 = vtanh.f32 %v2767_v26 }
 0xdbd   :  { %v2772_v52 = vpop.permute.xlu0 %963 }
 0xdbe   :  { %vm968_vm15 = vcmp.eq.s32.totalorder %v2772_v52, 1 }
 0xdbf   :  { %v2820_v61 = vsel %vm968_vm15, %v2757_v4, %v2754_v3  ;;  %v2847_v4 = vld [vmem:[%s3040_s0 + $0x70] sm:$0xff] }
 0xdc0   :  { %v2233_v55 = vpop.eup %2232 }
 0xdc1   :  { %948 = vrot.lane.b32.xlu0 %v2233_v55, %s2301_s1  ;;  %v2774_v54 = vpop.permute.xlu1 %966 }
 0xdc2   :  { %vm969_vm1 = vcmp.eq.s32.totalorder %v2774_v54, 1 }
 0xdc3   :  { %v2829_v18 = vsel %vm969_vm1, %v2767_v26, %v2763_v17  ;;  %v2852_v17 = vld [vmem:[%s3040_s0 + $0x68] sm:$0xff] }
 0xdc4   :  { %v2235_v58 = vpop.eup %2234 }
 0xdc5   :  { %950 = vrot.lane.b32.xlu1 %v2235_v58, %s2301_s1 }
 0xe33   :  { %v949_v63 = vpop.permute.xlu0 %948 }
 0xe34   :  { %v954_v7 = vmul.f32 %v949_v63, %v920_v50 }
 0xe36   :  { %v2781_v14 = vsel %vm968_vm15, %v954_v7, %v2707_v20  ;;  %vm1211_vm15 = vcmp.ne.s32.totalorder %v2852_v17, 1 }
 0xe37   :  { %v951_v12 = vpop.permute.xlu1 %950 }
 0xe38   :  { %v955_v13 = vmul.f32 %v951_v12, %v921_v53  ;;  %v1087_v53 = vsel %vm1085_vm3, 1, %v2297_v0  ;;  %vm1337_vm3 = vcmp.ne.s32.totalorder %v2859_v57, 1 }
 0xe3a   :  { %v2786_v15 = vsel %vm969_vm1, %v955_v13, %v2712_v21 }
 0xe3b   :  { %v976_v29 = vpack.c.bf16 %v2786_v15, %v2781_v14 }
 0xe3d   :  { %978 = vrot.lane.b32.xlu0 %v976_v29, %s2302_s19 }
 0xeaf   :  { %v979_v33 = vpop.permute.xlu0 %978 }
 0xeb0   :  { %2033 = vmatmul.mubr.msk.bf16.vlgmr.msra.gmra.mxu1 %vm349_vm14, %v979_v33 }
 0xeb1   :  { %2037 = vmatpush3.bf16.msra.mxu1 %v2367_v9  ;;  %2040 = vmatprep.mubr.msk.bf16.mxu1 %vm2299_vm0, %v2298_v1 }
 0xeb2   :  { %2038 = vmatprep.subr.bf16.mxu1 %v2298_v1 }
 0xeb5   :  { %2039 = vmatpush3.bf16.msra.mxu1 %v2373_v10 }
 0xeb6   :  { %2052 = vmatprep.subr.mxu1 %v2298_v1 }
 0xf70   :  { %v1017_v20 = vpop.f32.mrf.mxu1 }
 0xf71   :  { %v1024_v21 = vadd.f32 %v2730_v28, %v1017_v20 }
 0xf72   :  { %v2034_v34 = vpop.f32.mrf.mxu1 }
 0xf73   :  { %v1026_v35 = vmul.f32 2.0, %v1024_v21 }
 0xf74   :  { %v1020_v36 = vpop.f32.mrf.mxu1 }
 0xf75   :  { %v1028_v37 = vsel %vm2418_vm9, %v1026_v35, %v1024_v21  ;;  %v1025_v9 = vadd.f32 %v2732_v32, %v1020_v36 }
 0xf76   :  { %v1850_v27 = vmul.f32 -1.442695, %v1028_v37  ;;  %v2035_v38 = vpop.f32.mrf.mxu1 }
 0xf77   :  { %v1027_v39 = vmul.f32 2.0, %v1025_v9 }
 0xf78   :  { %2236 = vpow2.f32 %v1850_v27 }
 0xf79   :  { %v1029_v10 = vsel %vm2418_vm9, %v1027_v39, %v1025_v9 }
 0xf7a   :  { %v1851_v40 = vmul.f32 -1.442695, %v1029_v10 }
 0xf7c   :  { %2238 = vpow2.f32 %v1851_v40 }
 0xf85   :  { %v2237_v23 = vpop.eup %2236 }
 0xf86   :  { %v1036_v41 = vadd.f32 1.0, %v2237_v23 }
 0xf88   :  { %2240 = vrcp.f32 %v1036_v41 }
 0xf89   :  { %v2239_v28 = vpop.eup %2238 }
 0xf8a   :  { %v1037_v42 = vadd.f32 1.0, %v2239_v28 }
 0xf8c   :  { %2242 = vrcp.f32 %v1037_v42 }
 0xf95   :  { %v2241_v31 = vpop.eup %2240 }
 0xf96   :  { %v1042_v43 = vmul.f32 2.0, %v2241_v31 }
 0xf98   :  { %v1852_v44 = vadd.f32 -1.0, %v1042_v43 }
 0xf99   :  { %v2243_v25 = vpop.eup %2242 }
 0xf9a   :  { %v1046_v32 = vsel %vm2418_vm9, %v1852_v44, %v2241_v31  ;;  %v1043_v45 = vmul.f32 2.0, %v2243_v25 }
 0xf9b   :  { %1052 = vrot.lane.b32.xlu1 %v1046_v32, %s2301_s1  ;;  %v1048_v62 = vmul.f32 %v1046_v32, %v2820_v61 }
 0xf9c   :  { %v1853_v46 = vadd.f32 -1.0, %v1043_v45 }
 0xf9e   :  { %v1047_v47 = vsel %vm2418_vm9, %v1853_v46, %v2243_v25 }
 0xf9f   :  { %1054 = vrot.lane.b32.xlu0 %v1047_v47, %s2301_s1  ;;  %v1049_v59 = vmul.f32 %v1047_v47, %v2829_v18 }
0x100d   :  { %v1053_v48 = vpop.permute.xlu1 %1052 }
0x100e   :  { %v1058_v49 = vmul.f32 %v1053_v48, %v1046_v32 }
0x1010   :  { %1062 = vrot.lane.b32.xlu1 %v1058_v49, %s2302_s19 }
0x1011   :  { %v1055_v50 = vpop.permute.xlu0 %1054 }
0x1012   :  { %v1059_v2 = vmul.f32 %v1055_v50, %v1047_v47 }
0x1014   :  { %1089 = vperm.xlu1 %2165, %v1086_v51   ;;  %1064 = vrot.lane.b32.xlu0 %v1059_v2, %s2302_s19 }
0x1018   :  { %1092 = vperm.xlu0 %2164, %v1087_v53   ;;  %v1212_v53 = vsel %vm1210_vm13, 1, %v2297_v0 }
0x1082   :  { %v1063_v56 = vpop.permute.xlu1 %1062 }
0x1083   :  { %v2823_v60 = vadd.f32 %v1063_v56, %v1048_v62  ;;  %v1213_v56 = vsel %vm1211_vm15, 1, %v2297_v0 }
0x1085   :  { %2244 = vtanh.f32 %v2823_v60 }
0x1086   :  { %v1065_v6 = vpop.permute.xlu0 %1064 }
0x1087   :  { %v2833_v11 = vadd.f32 %v1065_v6, %v1049_v59 }
0x1089   :  { %2246 = vtanh.f32 %v2833_v11 }
0x108f   :  { %v2862_v24 = vpop.permute.xlu1 %1089 }
0x1090   :  { %vm1094_vm4 = vcmp.eq.s32.totalorder %v2862_v24, 1 }
0x1091   :  { %v2916_v59 = vsel %vm1094_vm4, %v2823_v60, %v2820_v61 }
0x1092   :  { %v2245_v3 = vpop.eup %2244 }
0x1093   :  { %1074 = vrot.lane.b32.xlu1 %v2245_v3, %s2301_s1  ;;  %v2864_v26 = vpop.permute.xlu0 %1092 }
0x1094   :  { %vm1095_vm5 = vcmp.eq.s32.totalorder %v2864_v26, 1 }
0x1096   :  { %v2247_v5 = vpop.eup %2246 }
0x1097   :  { %84 = vperm.xlu1 %2165, %v2840_v8   ;;  %1076 = vrot.lane.b32.xlu0 %v2247_v5, %s2301_s1  ;;  %v2925_v5 = vsel %vm1095_vm5, %v2833_v11, %v2829_v18 }
0x109b   :  { %90 = vperm.xlu1 %2165, %v2847_v4   ;;  %87 = vperm.xlu0 %2164, %v2852_v17  }
0x109f   :  { %93 = vperm.xlu0 %2164, %v2859_v57  }
0x1105   :  { %v1075_v55 = vpop.permute.xlu1 %1074 }
0x1106   :  { %v1080_v58 = vmul.f32 %v1075_v55, %v1046_v32 }
0x1108   :  { %v2871_v63 = vsel %vm1094_vm4, %v1080_v58, %v2781_v14  ;;  %vm1336_vm4 = vcmp.ne.s32.totalorder %v2847_v4, 1  ;;  %v1357_v4 = vld [vmem:[#allocation3 + $0x38] sm:$0xff] }
0x1109   :  { %v1077_v52 = vpop.permute.xlu0 %1076  ;;  %v1338_v30 = vsel %vm1336_vm4, 1, %v2297_v0 }
0x110a   :  { %v1081_v54 = vmul.f32 %v1077_v52, %v1047_v47 }
0x110c   :  { %v2876_v7 = vsel %vm1095_vm5, %v1081_v54, %v2786_v15 }
0x110d   :  { %v1102_v12 = vpack.c.bf16 %v2876_v7, %v2871_v63 }
0x110f   :  { %1104 = vrot.lane.b32.xlu1 %v1102_v12, %s2302_s19 }
0x1112   :  { %v85_v13 = vpop.permute.xlu1 %84 }
0x1113   :  { %vm107_vm6 = vcmp.eq.s32.totalorder %v2402_v19, %v85_v13 }
0x1116   :  { %v88_v29 = vpop.permute.xlu0 %87  ;;  %v91_v33 = vpop.permute.xlu1 %90 }
0x1117   :  { %vm108_vm7 = vcmp.eq.s32.totalorder %v2402_v19, %v88_v29  ;;  %vm109_vm10 = vcmp.eq.s32.totalorder %v2402_v19, %v91_v33 }
0x1118   :  { %vm1819_vm8 = vmpackc.low %vm108_vm7, %vm107_vm6 }
0x1119   :  { %1984 = vmatprep.mubr.msk.bf16.mxu0 %vm1819_vm8, %v2300_v22 }
0x111a   :  { %v94_v14 = vpop.permute.xlu0 %93 }
0x111b   :  { %vm110_vm11 = vcmp.eq.s32.totalorder %v2402_v19, %v94_v14 }
0x111c   :  { %vm1821_vm12 = vmpackc.low %vm110_vm11, %vm109_vm10 }
0x111d   :  { %1985 = vmatmul.mubr.msk.bf16.gmra.mxu0 %vm1821_vm12, %v2300_v22 }
0x111e   :  { %2048 = vmatprep.mubr.msk.bf16.mxu0 %vm2299_vm0, %v2298_v1 }
0x1181   :  { %v1105_v15 = vpop.permute.xlu1 %1104 }
0x1182   :  { %2041 = vmatmul.mubr.msk.bf16.vlgmr.msra.gmra.mxu1 %vm349_vm14, %v1105_v15 }
0x1183   :  { %2060 = vmatprep.mubr.msk.f32.mxu1 %vm2299_vm0, %v2298_v1  ;;  %2053 = vmatpush3.msra.mxu1 %v1357_v4 }
0x1184   :  { %2054 = vmatprep.subr.mxu1 %v2298_v1 }
0x11dd   :  { %v2892_v20 = vpop.f32.mrf.mxu0 }
0x11df   :  { %v297_v21 = vpop.f32.mrf.mxu0 }
0x11e1   :  { %v2894_v34 = vpop.f32.mrf.mxu0 }
0x11e3   :  { %v300_v9 = vpop.f32.mrf.mxu0 }
0x1242   :  { %v1143_v35 = vpop.f32.mrf.mxu1 }
0x1243   :  { %v1150_v36 = vadd.f32 %v1143_v35, %v297_v21 }
0x1244   :  { %v2042_v19 = vpop.f32.mrf.mxu1 }
0x1245   :  { %v1152_v37 = vmul.f32 2.0, %v1150_v36 }
0x1246   :  { %v1146_v22 = vpop.f32.mrf.mxu1 }
0x1247   :  { %v1154_v27 = vsel %vm2418_vm9, %v1152_v37, %v1150_v36  ;;  %v1151_v38 = vadd.f32 %v1146_v22, %v300_v9 }
0x1248   :  { %v1855_v39 = vmul.f32 -1.442695, %v1154_v27  ;;  %v2043_v10 = vpop.f32.mrf.mxu1 }
0x1249   :  { %v1153_v40 = vmul.f32 2.0, %v1151_v38 }
0x124a   :  { %2248 = vpow2.f32 %v1855_v39 }
0x124b   :  { %v1155_v23 = vsel %vm2418_vm9, %v1153_v40, %v1151_v38 }
0x124c   :  { %v1856_v41 = vmul.f32 -1.442695, %v1155_v23 }
0x124e   :  { %2250 = vpow2.f32 %v1856_v41 }
0x1257   :  { %v2249_v28 = vpop.eup %2248 }
0x1258   :  { %v1162_v42 = vadd.f32 1.0, %v2249_v28 }
0x125a   :  { %2252 = vrcp.f32 %v1162_v42 }
0x125b   :  { %v2251_v31 = vpop.eup %2250 }
0x125c   :  { %v1163_v43 = vadd.f32 1.0, %v2251_v31 }
0x125e   :  { %2254 = vrcp.f32 %v1163_v43 }
0x1267   :  { %v2253_v44 = vpop.eup %2252 }
0x1268   :  { %v1168_v25 = vmul.f32 2.0, %v2253_v44 }
0x126a   :  { %v1857_v32 = vadd.f32 -1.0, %v1168_v25 }
0x126b   :  { %v2255_v45 = vpop.eup %2254 }
0x126c   :  { %v1172_v46 = vsel %vm2418_vm9, %v1857_v32, %v2253_v44  ;;  %v1169_v47 = vmul.f32 2.0, %v2255_v45 }
0x126d   :  { %1178 = vrot.lane.b32.xlu0 %v1172_v46, %s2301_s1  ;;  %v1174_v6 = vmul.f32 %v1172_v46, %v2916_v59 }
0x126e   :  { %v1858_v48 = vadd.f32 -1.0, %v1169_v47 }
0x1270   :  { %v1173_v49 = vsel %vm2418_vm9, %v1858_v48, %v2255_v45 }
0x1271   :  { %1180 = vrot.lane.b32.xlu1 %v1173_v49, %s2301_s1  ;;  %v1175_v17 = vmul.f32 %v1173_v49, %v2925_v5 }
0x12df   :  { %v1179_v50 = vpop.permute.xlu0 %1178 }
0x12e0   :  { %v1184_v51 = vmul.f32 %v1179_v50, %v1172_v46 }
0x12e2   :  { %1188 = vrot.lane.b32.xlu0 %v1184_v51, %s2302_s19 }
0x12e3   :  { %v1181_v2 = vpop.permute.xlu1 %1180 }
0x12e4   :  { %v1185_v62 = vmul.f32 %v1181_v2, %v1173_v49 }
0x12e6   :  { %1215 = vperm.xlu0 %2164, %v1212_v53   ;;  %1190 = vrot.lane.b32.xlu1 %v1185_v62, %s2302_s19  ;;  %v1353_v62 = vld [vmem:[#allocation3 + $0x18] sm:$0xff] }
0x12ea   :  { %1218 = vperm.xlu1 %2165, %v1213_v56   ;;  %v1355_v56 = vld [vmem:[#allocation3 + $0x28] sm:$0xff] }
0x1354   :  { %v1189_v3 = vpop.permute.xlu0 %1188 }
0x1355   :  { %v2919_v8 = vadd.f32 %v1189_v3, %v1174_v6  ;;  %v1352_v6 = vld [vmem:[#allocation3 + $0x10] sm:$0xff] }
0x1357   :  { %2256 = vtanh.f32 %v2919_v8 }
0x1358   :  { %v1191_v55 = vpop.permute.xlu1 %1190 }
0x1359   :  { %v2929_v58 = vadd.f32 %v1191_v55, %v1175_v17  ;;  %v1350_v17 = vld [vmem:[#allocation3] sm:$0xff] }
0x135b   :  { %2258 = vtanh.f32 %v2929_v58 }
0x1361   :  { %v1216_v24 = vpop.permute.xlu0 %1215 }
0x1362   :  { %vm1220_vm1 = vcmp.eq.s32.totalorder %v1216_v24, 1 }
0x1364   :  { %v2257_v61 = vpop.eup %2256 }
0x1365   :  { %1200 = vrot.lane.b32.xlu0 %v2257_v61, %s2301_s1  ;;  %v1219_v52 = vpop.permute.xlu1 %1218 }
0x1366   :  { %vm1221_vm2 = vcmp.eq.s32.totalorder %v1219_v52, 1 }
0x1367   :  { %v1225_v47 = vsel %vm1221_vm2, %v2929_v58, %v2925_v5  ;;  %v1351_v5 = vld [vmem:[#allocation3 + $0x8] sm:$0xff] }
0x1368   :  { %v2259_v60 = vpop.eup %2258 }
0x1369   :  { %1202 = vrot.lane.b32.xlu1 %v2259_v60, %s2301_s1 }
0x13d7   :  { %v1201_v26 = vpop.permute.xlu0 %1200 }
0x13d8   :  { %v1206_v18 = vmul.f32 %v1201_v26, %v1172_v46  ;;  %v1339_v46 = vsel %vm1337_vm3, 1, %v2297_v0  ;;  %v1356_v0 = vld [vmem:[#allocation3 + $0x30] sm:$0xff] }
0x13d9   :  { %2055 = vmatpush3.msra.mxu1 %v1356_v0 }
0x13da   :  { %v2936_v12 = vsel %vm1220_vm1, %v1206_v18, %v2871_v63  ;;  %2056 = vmatprep.subr.mxu1 %v2298_v1 }
0x13db   :  { %v1203_v11 = vpop.permute.xlu1 %1202  ;;  %2057 = vmatpush3.msra.mxu1 %v1355_v56 }
0x13dc   :  { %v1207_v54 = vmul.f32 %v1203_v11, %v1173_v49  ;;  %v1224_v49 = vsel %vm1220_vm1, %v2919_v8, %v2916_v59  ;;  %v1354_v59 = vld [vmem:[#allocation3 + $0x20] sm:$0xff]  ;;  %2058 = vmatprep.subr.mxu1 %v2298_v1 }
0x13dd   :  { %2059 = vmatpush3.msra.mxu1 %v1354_v59 }
0x13de   :  { %v2940_v13 = vsel %vm1221_vm2, %v1207_v54, %v2876_v7  ;;  %2074 = vmatprep.subr.mxu1 %v2298_v1  ;;  %v1361_v54 = vld [vmem:[#allocation3 + $0x58] sm:$0xff] }
0x13df   :  { %v1228_v29 = vpack.c.bf16 %v2940_v13, %v2936_v12 }
0x13e1   :  { %1230 = vrot.lane.b32.xlu0 %v1228_v29, %s2302_s19 }
0x1453   :  { %v1231_v33 = vpop.permute.xlu0 %1230 }
0x1454   :  { %2049 = vmatmul.mubr.msk.bf16.vlgmr.msra.gmra.mxu0 %vm349_vm14, %v1231_v33  ;;  %v1360_v33 = vld [vmem:[#allocation3 + $0x50] sm:$0xff] }
0x1455   :  { %2071 = vmatprep.mubr.msk.f32.mxu0 %vm2299_vm0, %v2298_v1  ;;  %2064 = vmatpush3.msra.mxu0 %v1353_v62 }
0x1456   :  { %2065 = vmatprep.subr.mxu0 %v2298_v1 }
0x1457   :  { %2066 = vmatpush3.msra.mxu0 %v1352_v6 }
0x1458   :  { %2067 = vmatprep.subr.mxu0 %v2298_v1 }
0x1459   :  { %2068 = vmatpush3.msra.mxu0 %v1351_v5  ;;  %v1379_v5 = vld [vmem:[#allocation3 + $0xe8] sm:$0xff] }
0x145a   :  { %2069 = vmatprep.subr.mxu0 %v2298_v1 }
0x145b   :  { %2070 = vmatpush3.msra.mxu0 %v1350_v17 }
0x145c   :  { %2085 = vmatprep.subr.mxu0 %v2298_v1 }
0x1514   :  { %v1269_v14 = vpop.f32.mrf.mxu0 }
0x1515   :  { %v1276_v15 = vadd.f32 %v2892_v20, %v1269_v14  ;;  %v1377_v14 = vld [vmem:[#allocation3 + $0xd8] sm:$0xff] }
0x1516   :  { %v2050_v63 = vpop.f32.mrf.mxu0 }
0x1517   :  { %v1278_v21 = vmul.f32 2.0, %v1276_v15  ;;  %v1376_v63 = vld [vmem:[#allocation3 + $0xd0] sm:$0xff] }
0x1518   :  { %v1272_v35 = vpop.f32.mrf.mxu0 }
0x1519   :  { %v1280_v7 = vsel %vm2418_vm9, %v1278_v21, %v1276_v15  ;;  %v1277_v36 = vadd.f32 %v2894_v34, %v1272_v35  ;;  %v1358_v15 = vld [vmem:[#allocation3 + $0x40] sm:$0xff]  ;;  %v1375_v35 = vld [vmem:[#allocation3 + $0xc8] sm:$0xff] }
0x151a   :  { %v1860_v19 = vmul.f32 -1.442695, %v1280_v7  ;;  %v2051_v37 = vpop.f32.mrf.mxu0  ;;  %v1374_v7 = vld [vmem:[#allocation3 + $0xc0] sm:$0xff] }
0x151b   :  { %v1279_v9 = vmul.f32 2.0, %v1277_v36  ;;  %v1371_v37 = vld [vmem:[#allocation3 + $0xa8] sm:$0xff] }
0x151c   :  { %2260 = vpow2.f32 %v1860_v19  ;;  %v1372_v19 = vld [vmem:[#allocation3 + $0xb0] sm:$0xff] }
0x151d   :  { %v1281_v22 = vsel %vm2418_vm9, %v1279_v9, %v1277_v36  ;;  %v1373_v36 = vld [vmem:[#allocation3 + $0xb8] sm:$0xff]  ;;  %v1370_v9 = vld [vmem:[#allocation3 + $0xa0] sm:$0xff] }
0x151e   :  { %v1861_v27 = vmul.f32 -1.442695, %v1281_v22  ;;  %v1369_v22 = vld [vmem:[#allocation3 + $0x98] sm:$0xff] }
0x1520   :  { %2262 = vpow2.f32 %v1861_v27  ;;  %v1368_v27 = vld [vmem:[#allocation3 + $0x90] sm:$0xff] }
0x1529   :  { %v2261_v38 = vpop.eup %2260 }
0x152a   :  { %v1288_v39 = vadd.f32 1.0, %v2261_v38  ;;  %v1367_v38 = vld [vmem:[#allocation3 + $0x88] sm:$0xff] }
0x152c   :  { %2264 = vrcp.f32 %v1288_v39  ;;  %v1366_v39 = vld [vmem:[#allocation3 + $0x80] sm:$0xff] }
0x152d   :  { %v2263_v20 = vpop.eup %2262 }
0x152e   :  { %v1289_v10 = vadd.f32 1.0, %v2263_v20  ;;  %v1365_v20 = vld [vmem:[#allocation3 + $0x78] sm:$0xff] }
0x1530   :  { %2266 = vrcp.f32 %v1289_v10  ;;  %v1364_v10 = vld [vmem:[#allocation3 + $0x70] sm:$0xff] }
0x1539   :  { %v2265_v40 = vpop.eup %2264 }
0x153a   :  { %v1294_v23 = vmul.f32 2.0, %v2265_v40 }
0x153c   :  { %v1862_v41 = vadd.f32 -1.0, %v1294_v23  ;;  %v1362_v23 = vld [vmem:[#allocation3 + $0x60] sm:$0xff] }
0x153d   :  { %v2267_v28 = vpop.eup %2266 }
0x153e   :  { %v2956_v34 = vsel %vm2418_vm9, %v1862_v41, %v2265_v40  ;;  %v1295_v42 = vmul.f32 2.0, %v2267_v28  ;;  %v1363_v40 = vld [vmem:[#allocation3 + $0x68] sm:$0xff]  ;;  %v1393_v41 = vld [vmem:[#allocation3 + $0x158] sm:$0xff] }
0x153f   :  { %1304 = vrot.lane.b32.xlu0 %v2956_v34, %s2301_s1  ;;  %v1300_v51 = vmul.f32 %v2956_v34, %v1224_v49 }
0x1540   :  { %v1863_v31 = vadd.f32 -1.0, %v1295_v42  ;;  %v1390_v42 = vld [vmem:[#allocation3 + $0x140] sm:$0xff] }
0x1542   :  { %v1299_v43 = vsel %vm2418_vm9, %v1863_v31, %v2267_v28  ;;  %v1392_v28 = vld [vmem:[#allocation3 + $0x150] sm:$0xff]  ;;  %v1389_v31 = vld [vmem:[#allocation3 + $0x138] sm:$0xff] }
0x1543   :  { %1306 = vrot.lane.b32.xlu1 %v1299_v43, %s2301_s1  ;;  %v1301_v48 = vmul.f32 %v1299_v43, %v1225_v47  ;;  %v1381_v47 = vld [vmem:[#allocation3 + $0xf8] sm:$0xff] }
0x15b1   :  { %v1305_v44 = vpop.permute.xlu0 %1304 }
0x15b2   :  { %v1310_v25 = vmul.f32 %v1305_v44, %v2956_v34  ;;  %v1387_v44 = vld [vmem:[#allocation3 + $0x128] sm:$0xff] }
0x15b4   :  { %1314 = vrot.lane.b32.xlu0 %v1310_v25, %s2302_s19  ;;  %v1386_v25 = vld [vmem:[#allocation3 + $0x120] sm:$0xff] }
0x15b5   :  { %v1307_v32 = vpop.permute.xlu1 %1306 }
0x15b6   :  { %v1311_v45 = vmul.f32 %v1307_v32, %v1299_v43  ;;  %v1385_v32 = vld [vmem:[#allocation3 + $0x118] sm:$0xff] }
0x15b8   :  { %1316 = vrot.lane.b32.xlu1 %v1311_v45, %s2302_s19  ;;  %v1384_v45 = vld [vmem:[#allocation3 + $0x110] sm:$0xff] }
0x15bc   :  { %1344 = vperm.xlu1 %2165, %v1339_v46   ;;  %v1383_v46 = vld [vmem:[#allocation3 + $0x108] sm:$0xff] }
0x15c0   :  { %1341 = vperm.xlu1 %2165, %v1338_v30   ;;  %v1382_v30 = vld [vmem:[#allocation3 + $0x100] sm:$0xff] }
0x1626   :  { %v1315_v57 = vpop.permute.xlu0 %1314 }
0x1627   :  { %v1320_v53 = vadd.f32 %v1315_v57, %v1300_v51 }
0x162a   :  { %v1317_v50 = vpop.permute.xlu1 %1316 }
0x162b   :  { %v1321_v2 = vadd.f32 %v1317_v50, %v1301_v48  ;;  %v1623_v48 = vshrl.u32 %v45_v16, 7  ;;  %v1378_v16 = vld [vmem:[#allocation3 + $0xe0] sm:$0xff] }
0x162d   :  { %2268 = vtanh.f32 %v1321_v2  ;;  %v1624_v50 = vsub.s32 0, %v1623_v48  ;;  %v1394_v2 = vld [vmem:[#allocation3 + $0x160] sm:$0xff]  ;;  %v1630_v17 = vsub.s32 1, %v1623_v48 }
0x162e   :  { %2270 = vtanh.f32 %v1320_v53 }
0x162f   :  { %v1625_v0 = vrot.slane %v1394_v2, %v1624_v50 }
0x1637   :  { %v1345_v55 = vpop.permute.xlu1 %1344 }
0x1638   :  { %vm1347_vm9 = vcmp.eq.s32.totalorder %v1345_v55, 1  ;;  %v1631_v55 = vrot.slane %v1394_v2, %v1630_v17 }
0x163a   :  { %v2269_v3 = vpop.eup %2268 }
0x163b   :  { %1328 = vrot.lane.b32.xlu0 %v2269_v3, %s2301_s1  ;;  %v2271_v8 = vpop.eup %2270  ;;  %v1342_v60 = vpop.permute.xlu1 %1341 }
0x163c   :  { %vm1346_vm5 = vcmp.eq.s32.totalorder %v1342_v60, 1 }
0x163f   :  { %1326 = vrot.lane.b32.xlu0 %v2271_v8, %s2301_s1  ;;  %v1380_v8 = vld [vmem:[#allocation3 + $0xf0] sm:$0xff] }
0x16ad   :  { %v1329_v58 = vpop.permute.xlu0 %1328 }
0x16ae   :  { %v1333_v61 = vmul.f32 %v1329_v58, %v1299_v43  ;;  %v1388_v43 = vld [vmem:[#allocation3 + $0x130] sm:$0xff] }
0x16b0   :  { %v1349_v24 = vsel %vm1347_vm9, %v1333_v61, %v2940_v13  ;;  %v1359_v13 = vld [vmem:[#allocation3 + $0x48] sm:$0xff] }
0x16b1   :  { %1396 = vrot.lane.b32.xlu1 %v1349_v24, %s2302_s19  ;;  %v1327_v52 = vpop.permute.xlu0 %1326 }
0x16b2   :  { %v1332_v26 = vmul.f32 %v1327_v52, %v2956_v34  ;;  %v1391_v34 = vld [vmem:[#allocation3 + $0x148] sm:$0xff]  ;;  %v1705_v52 = vsub.s32 2, %v1623_v48 }
0x16b4   :  { %v1348_v18 = vsel %vm1346_vm5, %v1332_v26, %v2936_v12  ;;  %v1706_v26 = vrot.slane %v1394_v2, %v1705_v52 }
0x16b5   :  { %1471 = vrot.lane.b32.xlu0 %v1348_v18, %s2302_s19  ;;  %v1545_v11 = vmul.f32 %v1349_v24, %v1348_v18 }
0x16b7   :  { %1547 = vrot.lane.b32.xlu1 %v1545_v11, %s2302_s19 }
0x1723   :  { %v1397_v29 = vpop.permute.xlu1 %1396 }
0x1724   :  { %2061 = vmatmul.mubr.msk.f32.vlgmr.msra.gmra.mxu1 %vm349_vm14, %v1397_v29 }
0x1725   :  { %2075 = vmatpush3.msra.mxu1 %v1361_v54  ;;  %2082 = vmatprep.mubr.msk.f32.mxu1 %vm2299_vm0, %v2298_v1 }
0x1726   :  { %2076 = vmatprep.subr.mxu1 %v2298_v1 }
0x1727   :  { %2077 = vmatpush3.msra.mxu1 %v1360_v33  ;;  %v1472_v12 = vpop.permute.xlu0 %1471 }
0x1728   :  { %2078 = vmatprep.subr.mxu1 %v2298_v1  ;;  %2072 = vmatmul.mubr.msk.f32.vlgmr.msra.gmra.mxu0 %vm349_vm14, %v1472_v12 }
0x1729   :  { %2079 = vmatpush3.msra.mxu1 %v1359_v13  ;;  %v1548_v21 = vpop.permute.xlu1 %1547  ;;  %2086 = vmatpush3.msra.mxu0 %v1377_v14 }
0x172a   :  { %2080 = vmatprep.subr.mxu1 %v2298_v1  ;;  %2087 = vmatprep.subr.mxu0 %v2298_v1 }
0x172b   :  { %2081 = vmatpush3.msra.mxu1 %v1358_v15  ;;  %2088 = vmatpush3.msra.mxu0 %v1376_v63 }
0x172c   :  { %2083 = vmatmul.mubr.msk.f32.vlgmr.msra.gmra.mxu1 %vm349_vm14, %v1548_v21  ;;  %2089 = vmatprep.subr.mxu0 %v2298_v1 }
0x172d   :  { %2090 = vmatpush3.msra.mxu0 %v1375_v35  ;;  %2117 = vmatprep.mubr.msk.f32.mxu0 %vm2299_vm0, %v2298_v1 }
0x172e   :  { %2091 = vmatprep.subr.mxu0 %v2298_v1  ;;  %2120 = vmatprep.subr.mxu1 %v2298_v1 }
0x172f   :  { %2092 = vmatpush3.msra.mxu0 %v1374_v7  ;;  %2152 = vmatprep.mubr.msk.f32.mxu1 %vm2299_vm0, %v2298_v1 }
0x1730   :  { %2093 = vmatprep.subr.mxu0 %v2298_v1  ;;  %2121 = vmatpush3.msra.mxu1 %v1393_v41 }
0x1731   :  { %2094 = vmatpush3.msra.mxu0 %v1373_v36  ;;  %2122 = vmatprep.subr.mxu1 %v2298_v1 }
0x1732   :  { %2095 = vmatprep.subr.mxu0 %v2298_v1  ;;  %2123 = vmatpush3.msra.mxu1 %v1392_v28 }
0x1733   :  { %2096 = vmatpush3.msra.mxu0 %v1372_v19  ;;  %2124 = vmatprep.subr.mxu1 %v2298_v1 }
0x1734   :  { %2097 = vmatprep.subr.mxu0 %v2298_v1  ;;  %2125 = vmatpush3.msra.mxu1 %v1391_v34 }
0x1735   :  { %2098 = vmatpush3.msra.mxu0 %v1371_v37  ;;  %2126 = vmatprep.subr.mxu1 %v2298_v1 }
0x1736   :  { %2099 = vmatprep.subr.mxu0 %v2298_v1  ;;  %2127 = vmatpush3.msra.mxu1 %v1390_v42 }
0x1737   :  { %2100 = vmatpush3.msra.mxu0 %v1370_v9  ;;  %2128 = vmatprep.subr.mxu1 %v2298_v1 }
0x1738   :  { %2101 = vmatprep.subr.mxu0 %v2298_v1  ;;  %2129 = vmatpush3.msra.mxu1 %v1389_v31 }
0x1739   :  { %2102 = vmatpush3.msra.mxu0 %v1369_v22  ;;  %2130 = vmatprep.subr.mxu1 %v2298_v1 }
0x173a   :  { %2103 = vmatprep.subr.mxu0 %v2298_v1  ;;  %2131 = vmatpush3.msra.mxu1 %v1388_v43 }
0x173b   :  { %2104 = vmatpush3.msra.mxu0 %v1368_v27  ;;  %2132 = vmatprep.subr.mxu1 %v2298_v1 }
0x173c   :  { %2105 = vmatprep.subr.mxu0 %v2298_v1  ;;  %2133 = vmatpush3.msra.mxu1 %v1387_v44 }
0x173d   :  { %2106 = vmatpush3.msra.mxu0 %v1367_v38  ;;  %2134 = vmatprep.subr.mxu1 %v2298_v1 }
0x173e   :  { %2107 = vmatprep.subr.mxu0 %v2298_v1  ;;  %2135 = vmatpush3.msra.mxu1 %v1386_v25 }
0x173f   :  { %2108 = vmatpush3.msra.mxu0 %v1366_v39  ;;  %2136 = vmatprep.subr.mxu1 %v2298_v1 }
0x1740   :  { %2109 = vmatprep.subr.mxu0 %v2298_v1  ;;  %2137 = vmatpush3.msra.mxu1 %v1385_v32 }
0x1741   :  { %2110 = vmatpush3.msra.mxu0 %v1365_v20  ;;  %2138 = vmatprep.subr.mxu1 %v2298_v1 }
0x1742   :  { %2111 = vmatprep.subr.mxu0 %v2298_v1  ;;  %2139 = vmatpush3.msra.mxu1 %v1384_v45 }
0x1743   :  { %2112 = vmatpush3.msra.mxu0 %v1364_v10  ;;  %2140 = vmatprep.subr.mxu1 %v2298_v1 }
0x1744   :  { %2113 = vmatprep.subr.mxu0 %v2298_v1  ;;  %2141 = vmatpush3.msra.mxu1 %v1383_v46 }
0x1745   :  { %2114 = vmatpush3.msra.mxu0 %v1363_v40  ;;  %2142 = vmatprep.subr.mxu1 %v2298_v1 }
0x1746   :  { %2115 = vmatprep.subr.mxu0 %v2298_v1  ;;  %2143 = vmatpush3.msra.mxu1 %v1382_v30 }
0x1747   :  { %2116 = vmatpush3.msra.mxu0 %v1362_v23  ;;  %2144 = vmatprep.subr.mxu1 %v2298_v1 }
0x1748   :  { %2145 = vmatpush3.msra.mxu1 %v1381_v47 }
0x1749   :  { %2146 = vmatprep.subr.mxu1 %v2298_v1 }
0x174a   :  { %2147 = vmatpush3.msra.mxu1 %v1380_v8 }
0x174b   :  { %2148 = vmatprep.subr.mxu1 %v2298_v1 }
0x174c   :  { %2149 = vmatpush3.msra.mxu1 %v1379_v5 }
0x174d   :  { %2150 = vmatprep.subr.mxu1 %v2298_v1 }
0x174e   :  { %2151 = vmatpush3.msra.mxu1 %v1378_v16 }
0x17e4   :  { %v1466_v49 = vpop.f32.mrf.mxu1 }
0x17e6   :  { %v2062_v57 = vpop.f32.mrf.mxu1 }
0x17e8   :  { %v1541_v51 = vpop.f32.mrf.mxu0 }
0x17e9   :  { %v1542_v53 = vadd.f32 %v1541_v51, %v1466_v49 }
0x17ea   :  { %v2073_v4 = vpop.f32.mrf.mxu0 }
0x17ec   :  { %v1617_v62 = vpop.f32.mrf.mxu1 }
0x17ed   :  { %v1621_v56 = vadd.f32 %v1617_v62, %v1542_v53 }
0x17ee   :  { %v2084_v6 = vpop.f32.mrf.mxu1 }
0x17ef   :  { %v1626_v3 = vadd.f32 %v1625_v0, %v1621_v56 }
0x17f1   :  { %v1627_v59 = vmax.f32 %v1626_v3, 0.0 }
0x17f3   :  { %2118 = vmatmul.mubr.f32.vlgmr.msra.gmra.mxu0 %v1627_v59 }
0x18b3   :  { %v1698_v58 = vpop.f32.mrf.mxu0 }
0x18b4   :  { %v1699_v61 = vadd.f32 %v1698_v58, %v1631_v55 }
0x18b5   :  { %v2119_v60 = vpop.f32.mrf.mxu0 }
0x18b6   :  { %v1702_v24 = vmax.f32 %v1699_v61, 0.0 }
0x18b8   :  { %2153 = vmatmul.mubr.f32.vlgmr.msra.gmra.mxu1 %v1702_v24 }
0x1978   :  { %v1773_v18 = vpop.f32.mrf.mxu1 }
0x1979   :  { %v1774_v11 = vadd.f32 %v1773_v18, %v1706_v26 }
0x197a   :  { %v2154_v54 = vpop.f32.mrf.mxu1 }
0x197b   :  { %1777 = vst [vmem:[%s3043_s3] sm:$0xff] %v1774_v11 }
0x197c   :  { %1782 = vsyncpa [#allocation4], 1 }

</bundles_post_ra>
